<compile_context>
chip_gen: v6e
topology: v6e:2x2x1
jax: 0.10.0
libtpu: 0.0.40
codegen_flags: <defaults>
</compile_context>

<pallas_src>
import functools

import jax
import jax.numpy as jnp
from jax.experimental import pallas as pl
from jax.experimental.pallas import tpu as pltpu


# ----------------------------------------------------------------------------
# Kernel helpers
# ----------------------------------------------------------------------------
def _apply_act(out, act, activation):
    if not act:
        return out
    if activation == "relu":
        return jnp.maximum(out, 0.0)
    if activation == "lrelu":
        return jnp.where(out >= 0.0, out, 0.01 * out)  # nn.LeakyReLU default slope
    if activation == "tanh":
        return jnp.tanh(out)
    raise ValueError(f"unsupported activation: {activation}")


def _start_halo_copies(xany_ref, top_buf, bot_buf, sem, hs):
    """Kick off DMAs for the row above / below the current strip (clamped)."""
    n = pl.program_id(0)
    s = pl.program_id(1)
    h_total = xany_ref.shape[2]
    start = s * hs
    top_idx = jnp.maximum(start - 1, 0)
    bot_idx = jnp.minimum(start + hs, h_total - 1)
    cp_top = pltpu.make_async_copy(
        xany_ref.at[pl.ds(n, 1), :, pl.ds(top_idx, 1), :], top_buf, sem.at[0])
    cp_bot = pltpu.make_async_copy(
        xany_ref.at[pl.ds(n, 1), :, pl.ds(bot_idx, 1), :], bot_buf, sem.at[1])
    cp_top.start()
    cp_bot.start()
    return cp_top, cp_bot


def _halo_taps(top_buf, bot_buf, w, width, s):
    """Column-tap partial sums for the two halo rows (tiny VPU work).

    Boundary strips multiply their (clamped, hence garbage-but-valid) halo row
    by 0 so it contributes nothing -- equivalent to zero padding.
    """
    top_valid = (s > 0).astype(jnp.float32)
    bot_valid = (s < pl.num_programs(1) - 1).astype(jnp.float32)
    col = jax.lax.broadcasted_iota(jnp.int32, (1, 1, 1, width), 3)

    def tap(buf, w0, w1, w2, valid):
        h = buf[...].astype(jnp.float32)                        # (1, C, 1, W)
        h_l = jnp.where(col == 0, 0.0, pltpu.roll(h, 1, axis=3))
        h_r = jnp.where(col == width - 1, 0.0, pltpu.roll(h, width - 1, axis=3))
        return (w0 * h_l + w1 * h + w2 * h_r) * valid

    tap_top = tap(top_buf, w[0], w[1], w[2], top_valid)   # conv-kernel row 0
    tap_bot = tap(bot_buf, w[6], w[7], w[8], bot_valid)   # conv-kernel row 2
    return tap_top, tap_bot


# ----------------------------------------------------------------------------
# Kernel bodies
# ----------------------------------------------------------------------------
def _bottleneck_kernel_mxu(w_ref, b_ref, m_ref, x_ref, xany_ref, o_ref,
                           top_buf, bot_buf, sem, *, act, activation):
    """Column taps on the MXU via banded WxW matmuls; row shifts on the XLU."""
    _, C, Hs, W = o_ref.shape
    s = pl.program_id(1)

    cp_top, cp_bot = _start_halo_copies(xany_ref, top_buf, bot_buf, sem, Hs)

    # Scalar SMEM reads before any DMA wait (keeps sst->sld forwarding intact).
    w = [w_ref[k] for k in range(9)]
    bias = b_ref[0]

    x = x_ref[...].astype(jnp.float32)                      # (1, C, Hs, W)
    ch_b = jnp.max(x, axis=1, keepdims=True) + bias         # (1, 1, Hs, W)

    # (1,C,Hs,W) -> (C*Hs, W): pure retiling when Hs % 8 == 0 (guaranteed by
    # the wrapper for this path), so the reshape is free.
    x2 = x.reshape(C * Hs, W)
    dot = functools.partial(jnp.dot, preferred_element_type=jnp.float32,
                            precision=jax.lax.Precision.HIGHEST)

    cp_top.wait()
    cp_bot.wait()
    tap_top, tap_bot = _halo_taps(top_buf, bot_buf, w, W, s)

    row = jax.lax.broadcasted_iota(jnp.int32, (1, 1, Hs, W), 2)

    # Banded matmuls produce, per conv-kernel row k, the full 3-tap column
    # stencil with zero column halo.  Row (sublane) shifts via XLU roll; the
    # wrapped boundary row is replaced by the halo contribution.
    t = dot(x2, m_ref[0]).reshape(1, C, Hs, W)
    acc = jnp.where(row == 0, tap_top, pltpu.roll(t, 1, axis=2))
    acc = acc + dot(x2, m_ref[1]).reshape(1, C, Hs, W)
    t = dot(x2, m_ref[2]).reshape(1, C, Hs, W)
    acc = acc + jnp.where(row == Hs - 1, tap_bot, pltpu.roll(t, Hs - 1, axis=2))

    out = _apply_act(acc + ch_b, act, activation)
    o_ref[...] = out.astype(o_ref.dtype)


def _bottleneck_kernel_vpu(w_ref, b_ref, x_ref, xany_ref, o_ref,
                           top_buf, bot_buf, sem, *, act, activation):
    """Pure VPU/XLU fallback: 3x3 stencil via lane/sublane rolls + masks."""
    _, C, Hs, W = o_ref.shape
    s = pl.program_id(1)

    cp_top, cp_bot = _start_halo_copies(xany_ref, top_buf, bot_buf, sem, Hs)

    w = [w_ref[k] for k in range(9)]
    bias = b_ref[0]

    x = x_ref[...].astype(jnp.float32)                      # (1, C, Hs, W)
    ch_b = jnp.max(x, axis=1, keepdims=True) + bias         # (1, 1, Hs, W)

    col = jax.lax.broadcasted_iota(jnp.int32, (1, 1, Hs, W), 3)
    x_l = jnp.where(col == 0, 0.0, pltpu.roll(x, 1, axis=3))
    x_r = jnp.where(col == W - 1, 0.0, pltpu.roll(x, W - 1, axis=3))

    cp_top.wait()
    cp_bot.wait()
    tap_top, tap_bot = _halo_taps(top_buf, bot_buf, w, W, s)

    row = jax.lax.broadcasted_iota(jnp.int32, (1, 1, Hs, W), 2)

    # Accumulate row contributions one at a time to limit live f32 temporaries.
    t = w[0] * x_l + w[1] * x + w[2] * x_r
    acc = jnp.where(row == 0, tap_top, pltpu.roll(t, 1, axis=2))
    acc = acc + (w[3] * x_l + w[4] * x + w[5] * x_r)
    t = w[6] * x_l + w[7] * x + w[8] * x_r
    acc = acc + jnp.where(row == Hs - 1, tap_bot, pltpu.roll(t, Hs - 1, axis=2))

    out = _apply_act(acc + ch_b, act, activation)
    o_ref[...] = out.astype(o_ref.dtype)


# ----------------------------------------------------------------------------
# Wrapper: strip sizing, banded matrices, pallas_call
# ----------------------------------------------------------------------------
def _vmem_limit_bytes():
    try:
        cap = int(pltpu.get_tpu_info().vmem_capacity_bytes)
    except Exception:
        cap = 64 * 1024 * 1024  # conservative fallback (v7x-sized)
    # 3/4 of physical, capped at 96 MiB: 48 MiB on v7x, 96 MiB on v5e/v6e.
    return min((cap * 3) // 4, 96 * 1024 * 1024)


def _choose_strip(H, C, W, itemsize):
    """Largest H-strip (multiple of 8, divisor of H) fitting the VMEM budget."""
    limit = _vmem_limit_bytes()
    budget = limit // 2
    # Per strip row: double-buffered in + out blocks (input dtype) plus ~5 live
    # f32 full-strip temporaries inside the kernel body.
    per_row = C * W * (4 * itemsize + 5 * 4)
    hs_max = max(1, budget // per_row)
    # >=2 strips per image (when H allows) keeps the pipeline and both v7x
    # TensorCores fed even for tiny batch sizes.
    soft_cap = H if H < 16 else max(8, H // 2)

    divisors = [d for d in range(1, H + 1) if H % d == 0]
    good = [d for d in divisors if d % 8 == 0 and d <= min(hs_max, soft_cap)]
    if good:
        hs = max(good)
    elif H <= max(hs_max, 8):
        hs = H                                   # small maps: one whole strip
    else:
        mul8 = [d for d in divisors if d % 8 == 0]
        hs = min(mul8) if mul8 else H            # TODO(synk): ragged-H strips
    return hs, limit


def _banded_matrices(weight, W):
    """Three WxW tridiagonal matrices encoding the column taps (zero halo)."""
    i = jnp.arange(W)
    d = i[None, :] - i[:, None]                  # d[j', j] = j - j'
    w = weight.astype(jnp.float32)

    def band(wrow):
        return (jnp.where(d == 1, wrow[0], 0.0)
                + jnp.where(d == 0, wrow[1], 0.0)
                + jnp.where(d == -1, wrow[2], 0.0)).astype(jnp.float32)

    return jnp.stack([band(w[0]), band(w[1]), band(w[2])], axis=0)   # (3,W,W)


def bottleneck_block_forward(x, weight, bias, act=True, activation="relu",
                             use_mxu_taps=True):
    """x: [N, C, H, W]; weight: f32[3, 3]; bias: f32[1]."""
    N, C, H, W = x.shape
    if act and activation not in ("relu", "lrelu", "tanh"):
        raise ValueError(f"unsupported activation: {activation}")

    Hs, vmem_limit = _choose_strip(H, C, W, jnp.dtype(x.dtype).itemsize)
    n_strips = H // Hs

    w_flat = weight.reshape(9).astype(jnp.float32)
    b = bias.reshape(1).astype(jnp.float32)

    x_spec = pl.BlockSpec((1, C, Hs, W), lambda n, s: (n, 0, s, 0))
    out_spec = pl.BlockSpec((1, C, Hs, W), lambda n, s: (n, 0, s, 0))
    smem_spec = pl.BlockSpec(memory_space=pltpu.MemorySpace.SMEM)
    any_spec = pl.BlockSpec(memory_space=pl.ANY)   # halo rows fetched manually

    scratch_shapes = [
        pltpu.VMEM((1, C, 1, W), x.dtype),          # top halo row
        pltpu.VMEM((1, C, 1, W), x.dtype),          # bottom halo row
        pltpu.SemaphoreType.DMA((2,)),
    ]

    # The MXU path's free (C*Hs, W) retiling needs Hs % 8 == 0.
    mxu = use_mxu_taps and (Hs % 8 == 0)
    if mxu:
        bands = _banded_matrices(weight, W)
        kernel = functools.partial(_bottleneck_kernel_mxu,
                                   act=act, activation=activation)
        in_specs = [smem_spec, smem_spec,
                    pl.BlockSpec((3, W, W), lambda n, s: (0, 0, 0)),
                    x_spec, any_spec]
        args = (w_flat, b, bands, x, x)
    else:
        kernel = functools.partial(_bottleneck_kernel_vpu,
                                   act=act, activation=activation)
        in_specs = [smem_spec, smem_spec, x_spec, any_spec]
        args = (w_flat, b, x, x)

    return pl.pallas_call(
        kernel,
        out_shape=jax.ShapeDtypeStruct((N, C, H, W), x.dtype),
        grid_spec=pltpu.PrefetchScalarGridSpec(
            num_scalar_prefetch=0,
            grid=(N, n_strips),
            in_specs=in_specs,
            out_specs=out_spec,
            scratch_shapes=scratch_shapes),
        compiler_params=pltpu.CompilerParams(
            dimension_semantics=("parallel", "parallel"),
            vmem_limit_bytes=vmem_limit),
    )(*args)


# ----------------------------------------------------------------------------
# Pure-JAX reference + self-test
# ----------------------------------------------------------------------------
def _reference(x, weight, bias, act=True, activation="relu"):
    N, C, H, W = x.shape
    ch_max = jnp.max(x.astype(jnp.float32), axis=1, keepdims=True)
    xp = jnp.pad(x.astype(jnp.float32), ((0, 0), (0, 0), (1, 1), (1, 1)))
    acc = jnp.full((N, C, H, W), bias[0], dtype=jnp.float32)
    for di in range(3):
        for dj in range(3):
            acc = acc + weight[di, dj] * xp[:, :, di:di + H, dj:dj + W]
    out = acc + ch_max
    if act:
        if activation == "relu":
            out = jnp.maximum(out, 0.0)
        elif activation == "lrelu":
            out = jnp.where(out >= 0.0, out, 0.01 * out)
        elif activation == "tanh":
            out = jnp.tanh(out)
    return out.astype(x.dtype)


if __name__ == "__main__":
    key = jax.random.PRNGKey(0)
    k_x, k_w, k_b = jax.random.split(key, 3)

    # Small NCHW shapes; W=128 keeps output stores lane-dense, H=16 with the
    # chosen Hs=8 exercises the H-strip halo path.
    N, C, H, W = 2, 4, 16, 128
    x = jax.random.normal(k_x, (N, C, H, W), dtype=jnp.float32)

    # Deterministic "Conv2d(1,1,3,3)" parameters (kaiming-uniform-like range).
    fan_in = 1 * 3 * 3
    bound = 1.0 / (fan_in ** 0.5)
    weight = jax.random.uniform(k_w, (3, 3), jnp.float32, -bound, bound)
    bias = jax.random.uniform(k_b, (1,), jnp.float32, -bound, bound)

    configs = [
        dict(act=True, activation="relu", use_mxu_taps=True),
        dict(act=True, activation="relu", use_mxu_taps=False),
        dict(act=True, activation="lrelu", use_mxu_taps=True),
        dict(act=True, activation="tanh", use_mxu_taps=True),
        dict(act=False, activation="relu", use_mxu_taps=True),
    ]
    for cfg in configs:
        out = bottleneck_block_forward(x, weight, bias, **cfg)
        out = jax.block_until_ready(out)
        ref = _reference(x, weight, bias, act=cfg["act"],
                         activation=cfg["activation"])
        assert out.shape == (N, C, H, W)
        assert jnp.allclose(out, ref, atol=1e-5, rtol=1e-5), cfg

    print("KERNEL_OK")
</pallas_src>

<mosaic_0001>
module attributes {stable_mosaic.version = 11 : i64} {
  func.func @_bottleneck_kernel_mxu(%arg0: i32, %arg1: i32, %arg2: memref<9xf32, #tpu.memory_space<smem>>, %arg3: memref<1xf32, #tpu.memory_space<smem>>, %arg4: memref<3x128x128xf32, #tpu.memory_space<vmem>>, %arg5: memref<1x4x8x128xf32, #tpu.memory_space<vmem>>, %arg6: memref<2x4x16x128xf32, #tpu.memory_space<any>>, %arg7: memref<1x4x8x128xf32, #tpu.memory_space<vmem>>, %arg8: memref<1x4x1x128xf32, #tpu.memory_space<vmem>>, %arg9: memref<1x4x1x128xf32, #tpu.memory_space<vmem>>, %arg10: memref<2x!tpu.dma_semaphore, #tpu.memory_space<semaphore_mem>>) attributes {dimension_semantics = [#tpu.dimension_semantics<parallel>, #tpu.dimension_semantics<parallel>], iteration_bounds = array<i64: 2, 2>, scalar_prefetch = 0 : i64, scratch_operands = 3 : i64, tpu.core_type = #tpu.core_type<tc>, window_params = [{transform_indices = @transform_0, window_bounds = array<i64: 9>}, {transform_indices = @transform_1, window_bounds = array<i64: 1>}, {pipeline_mode = #tpu.pipeline_mode<synchronous>, transform_indices = @transform_2, window_bounds = array<i64: 3, 128, 128>}, {transform_indices = @transform_3, window_bounds = array<i64: 1, 4, 8, 128>}, {}, {transform_indices = @transform_5, window_bounds = array<i64: 1, 4, 8, 128>}]} {
    %c8_i32 = arith.constant 8 : i32
    %0 = arith.muli %arg1, %c8_i32 : i32
    %c1_i32 = arith.constant 1 : i32
    %1 = arith.subi %0, %c1_i32 : i32
    %c0_i32 = arith.constant 0 : i32
    %2 = arith.maxsi %1, %c0_i32 : i32
    %c8_i32_0 = arith.constant 8 : i32
    %3 = arith.addi %0, %c8_i32_0 : i32
    %c15_i32 = arith.constant 15 : i32
    %4 = arith.minsi %3, %c15_i32 : i32
    %c0_i32_1 = arith.constant 0 : i32
    %c0_i32_2 = arith.constant 0 : i32
    %c0_i32_3 = arith.constant 0 : i32
    %5 = tpu.memref_slice %arg6[%arg0, %c0_i32_2, %2, %c0_i32_3] : memref<2x4x16x128xf32, #tpu.memory_space<any>> -> memref<1x4x1x128xf32, #tpu.memory_space<any>>
    %6 = tpu.memref_slice %arg10[%c0_i32_1] : memref<2x!tpu.dma_semaphore, #tpu.memory_space<semaphore_mem>> -> memref<1x!tpu.dma_semaphore, #tpu.memory_space<semaphore_mem>>
    %7 = tpu.memref_squeeze %6 : memref<1x!tpu.dma_semaphore, #tpu.memory_space<semaphore_mem>> -> memref<!tpu.dma_semaphore, #tpu.memory_space<semaphore_mem>>
    tpu.enqueue_dma source(%5 : memref<1x4x1x128xf32, #tpu.memory_space<any>>) target(%arg8 : memref<1x4x1x128xf32, #tpu.memory_space<vmem>>) target_semaphore(%7 : memref<!tpu.dma_semaphore, #tpu.memory_space<semaphore_mem>>)
    %c1_i32_4 = arith.constant 1 : i32
    %c0_i32_5 = arith.constant 0 : i32
    %c0_i32_6 = arith.constant 0 : i32
    %8 = tpu.memref_slice %arg6[%arg0, %c0_i32_5, %4, %c0_i32_6] : memref<2x4x16x128xf32, #tpu.memory_space<any>> -> memref<1x4x1x128xf32, #tpu.memory_space<any>>
    %9 = tpu.memref_slice %arg10[%c1_i32_4] : memref<2x!tpu.dma_semaphore, #tpu.memory_space<semaphore_mem>> -> memref<1x!tpu.dma_semaphore, #tpu.memory_space<semaphore_mem>>
    %10 = tpu.memref_squeeze %9 : memref<1x!tpu.dma_semaphore, #tpu.memory_space<semaphore_mem>> -> memref<!tpu.dma_semaphore, #tpu.memory_space<semaphore_mem>>
    tpu.enqueue_dma source(%8 : memref<1x4x1x128xf32, #tpu.memory_space<any>>) target(%arg9 : memref<1x4x1x128xf32, #tpu.memory_space<vmem>>) target_semaphore(%10 : memref<!tpu.dma_semaphore, #tpu.memory_space<semaphore_mem>>)
    %c0 = arith.constant 0 : index
    %11 = memref.load %arg2[%c0] : memref<9xf32, #tpu.memory_space<smem>>
    %c1 = arith.constant 1 : index
    %12 = memref.load %arg2[%c1] : memref<9xf32, #tpu.memory_space<smem>>
    %c2 = arith.constant 2 : index
    %13 = memref.load %arg2[%c2] : memref<9xf32, #tpu.memory_space<smem>>
    %c6 = arith.constant 6 : index
    %14 = memref.load %arg2[%c6] : memref<9xf32, #tpu.memory_space<smem>>
    %c7 = arith.constant 7 : index
    %15 = memref.load %arg2[%c7] : memref<9xf32, #tpu.memory_space<smem>>
    %c8 = arith.constant 8 : index
    %16 = memref.load %arg2[%c8] : memref<9xf32, #tpu.memory_space<smem>>
    %c0_7 = arith.constant 0 : index
    %17 = memref.load %arg3[%c0_7] : memref<1xf32, #tpu.memory_space<smem>>
    %c0_8 = arith.constant 0 : index
    %c0_9 = arith.constant 0 : index
    %c0_10 = arith.constant 0 : index
    %c0_11 = arith.constant 0 : index
    %18 = vector.load %arg5[%c0_8, %c0_9, %c0_10, %c0_11] : memref<1x4x8x128xf32, #tpu.memory_space<vmem>>, vector<1x4x8x128xf32>
    %cst = arith.constant dense<0xFF800000> : vector<1x8x128xf32>
    %19 = vector.multi_reduction <maximumf>, %18, %cst [1] : vector<1x4x8x128xf32> to vector<1x8x128xf32>
    %20 = vector.shape_cast %19 : vector<1x8x128xf32> to vector<1x1x8x128xf32>
    %21 = vector.broadcast %17 : f32 to vector<1x1x8x128xf32>
    %22 = arith.addf %20, %21 : vector<1x1x8x128xf32>
    %23 = vector.shape_cast %18 : vector<1x4x8x128xf32> to vector<32x128xf32>
    %c0_i32_12 = arith.constant 0 : i32
    %c0_i32_13 = arith.constant 0 : i32
    %c0_i32_14 = arith.constant 0 : i32
    %24 = tpu.memref_slice %arg6[%arg0, %c0_i32_13, %2, %c0_i32_14] : memref<2x4x16x128xf32, #tpu.memory_space<any>> -> memref<1x4x1x128xf32, #tpu.memory_space<any>>
    %25 = tpu.memref_slice %arg10[%c0_i32_12] : memref<2x!tpu.dma_semaphore, #tpu.memory_space<semaphore_mem>> -> memref<1x!tpu.dma_semaphore, #tpu.memory_space<semaphore_mem>>
    %26 = tpu.memref_squeeze %25 : memref<1x!tpu.dma_semaphore, #tpu.memory_space<semaphore_mem>> -> memref<!tpu.dma_semaphore, #tpu.memory_space<semaphore_mem>>
    tpu.wait_dma2 semaphore(%26 : memref<!tpu.dma_semaphore, #tpu.memory_space<semaphore_mem>>) src(%24 : memref<1x4x1x128xf32, #tpu.memory_space<any>>) dst(%arg8 : memref<1x4x1x128xf32, #tpu.memory_space<vmem>>)
    %c1_i32_15 = arith.constant 1 : i32
    %c0_i32_16 = arith.constant 0 : i32
    %c0_i32_17 = arith.constant 0 : i32
    %27 = tpu.memref_slice %arg6[%arg0, %c0_i32_16, %4, %c0_i32_17] : memref<2x4x16x128xf32, #tpu.memory_space<any>> -> memref<1x4x1x128xf32, #tpu.memory_space<any>>
    %28 = tpu.memref_slice %arg10[%c1_i32_15] : memref<2x!tpu.dma_semaphore, #tpu.memory_space<semaphore_mem>> -> memref<1x!tpu.dma_semaphore, #tpu.memory_space<semaphore_mem>>
    %29 = tpu.memref_squeeze %28 : memref<1x!tpu.dma_semaphore, #tpu.memory_space<semaphore_mem>> -> memref<!tpu.dma_semaphore, #tpu.memory_space<semaphore_mem>>
    tpu.wait_dma2 semaphore(%29 : memref<!tpu.dma_semaphore, #tpu.memory_space<semaphore_mem>>) src(%27 : memref<1x4x1x128xf32, #tpu.memory_space<any>>) dst(%arg9 : memref<1x4x1x128xf32, #tpu.memory_space<vmem>>)
    %c0_i32_18 = arith.constant 0 : i32
    %30 = arith.cmpi sgt, %arg1, %c0_i32_18 : i32
    %31 = arith.extui %30 : i1 to i32
    %32 = arith.sitofp %31 : i32 to f32
    %c1_i32_19 = arith.constant 1 : i32
    %33 = arith.cmpi slt, %arg1, %c1_i32_19 : i32
    %34 = arith.extui %33 : i1 to i32
    %35 = arith.sitofp %34 : i32 to f32
    %36 = tpu.iota {dimensions = array<i32: 3>} : vector<1x1x1x128xi32>
    %c0_20 = arith.constant 0 : index
    %c0_21 = arith.constant 0 : index
    %c0_22 = arith.constant 0 : index
    %c0_23 = arith.constant 0 : index
    %37 = vector.load %arg8[%c0_20, %c0_21, %c0_22, %c0_23] : memref<1x4x1x128xf32, #tpu.memory_space<vmem>>, vector<1x4x1x128xf32>
    %c0_i32_24 = arith.constant 0 : i32
    %38 = vector.broadcast %c0_i32_24 : i32 to vector<1x1x1x128xi32>
    %39 = arith.cmpi eq, %36, %38 : vector<1x1x1x128xi32>
    %c1_i32_25 = arith.constant 1 : i32
    %40 = tpu.dynamic_rotate %37 by %c1_i32_25 dim 3 : vector<1x4x1x128xf32>, i32 -> vector<1x4x1x128xf32>
    %cst_26 = arith.constant 0.000000e+00 : f32
    %41 = vector.shape_cast %39 : vector<1x1x1x128xi1> to vector<1x1x1x128xi1>
    %42 = vector.broadcast %41 : vector<1x1x1x128xi1> to vector<1x4x1x128xi1>
    %43 = vector.broadcast %cst_26 : f32 to vector<1x4x1x128xf32>
    %44 = arith.select %42, %43, %40 : vector<1x4x1x128xi1>, vector<1x4x1x128xf32>
    %c127_i32 = arith.constant 127 : i32
    %45 = vector.broadcast %c127_i32 : i32 to vector<1x1x1x128xi32>
    %46 = arith.cmpi eq, %36, %45 : vector<1x1x1x128xi32>
    %c127_i32_27 = arith.constant 127 : i32
    %47 = tpu.dynamic_rotate %37 by %c127_i32_27 dim 3 : vector<1x4x1x128xf32>, i32 -> vector<1x4x1x128xf32>
    %cst_28 = arith.constant 0.000000e+00 : f32
    %48 = vector.shape_cast %46 : vector<1x1x1x128xi1> to vector<1x1x1x128xi1>
    %49 = vector.broadcast %48 : vector<1x1x1x128xi1> to vector<1x4x1x128xi1>
    %50 = vector.broadcast %cst_28 : f32 to vector<1x4x1x128xf32>
    %51 = arith.select %49, %50, %47 : vector<1x4x1x128xi1>, vector<1x4x1x128xf32>
    %52 = vector.broadcast %11 : f32 to vector<1x4x1x128xf32>
    %53 = arith.mulf %52, %44 : vector<1x4x1x128xf32>
    %54 = vector.broadcast %12 : f32 to vector<1x4x1x128xf32>
    %55 = arith.mulf %54, %37 : vector<1x4x1x128xf32>
    %56 = arith.addf %53, %55 : vector<1x4x1x128xf32>
    %57 = vector.broadcast %13 : f32 to vector<1x4x1x128xf32>
    %58 = arith.mulf %57, %51 : vector<1x4x1x128xf32>
    %59 = arith.addf %56, %58 : vector<1x4x1x128xf32>
    %60 = vector.broadcast %32 : f32 to vector<1x4x1x128xf32>
    %61 = arith.mulf %59, %60 : vector<1x4x1x128xf32>
    %c0_29 = arith.constant 0 : index
    %c0_30 = arith.constant 0 : index
    %c0_31 = arith.constant 0 : index
    %c0_32 = arith.constant 0 : index
    %62 = vector.load %arg9[%c0_29, %c0_30, %c0_31, %c0_32] : memref<1x4x1x128xf32, #tpu.memory_space<vmem>>, vector<1x4x1x128xf32>
    %c0_i32_33 = arith.constant 0 : i32
    %63 = vector.broadcast %c0_i32_33 : i32 to vector<1x1x1x128xi32>
    %64 = arith.cmpi eq, %36, %63 : vector<1x1x1x128xi32>
    %c1_i32_34 = arith.constant 1 : i32
    %65 = tpu.dynamic_rotate %62 by %c1_i32_34 dim 3 : vector<1x4x1x128xf32>, i32 -> vector<1x4x1x128xf32>
    %cst_35 = arith.constant 0.000000e+00 : f32
    %66 = vector.shape_cast %64 : vector<1x1x1x128xi1> to vector<1x1x1x128xi1>
    %67 = vector.broadcast %66 : vector<1x1x1x128xi1> to vector<1x4x1x128xi1>
    %68 = vector.broadcast %cst_35 : f32 to vector<1x4x1x128xf32>
    %69 = arith.select %67, %68, %65 : vector<1x4x1x128xi1>, vector<1x4x1x128xf32>
    %c127_i32_36 = arith.constant 127 : i32
    %70 = vector.broadcast %c127_i32_36 : i32 to vector<1x1x1x128xi32>
    %71 = arith.cmpi eq, %36, %70 : vector<1x1x1x128xi32>
    %c127_i32_37 = arith.constant 127 : i32
    %72 = tpu.dynamic_rotate %62 by %c127_i32_37 dim 3 : vector<1x4x1x128xf32>, i32 -> vector<1x4x1x128xf32>
    %cst_38 = arith.constant 0.000000e+00 : f32
    %73 = vector.shape_cast %71 : vector<1x1x1x128xi1> to vector<1x1x1x128xi1>
    %74 = vector.broadcast %73 : vector<1x1x1x128xi1> to vector<1x4x1x128xi1>
    %75 = vector.broadcast %cst_38 : f32 to vector<1x4x1x128xf32>
    %76 = arith.select %74, %75, %72 : vector<1x4x1x128xi1>, vector<1x4x1x128xf32>
    %77 = vector.broadcast %14 : f32 to vector<1x4x1x128xf32>
    %78 = arith.mulf %77, %69 : vector<1x4x1x128xf32>
    %79 = vector.broadcast %15 : f32 to vector<1x4x1x128xf32>
    %80 = arith.mulf %79, %62 : vector<1x4x1x128xf32>
    %81 = arith.addf %78, %80 : vector<1x4x1x128xf32>
    %82 = vector.broadcast %16 : f32 to vector<1x4x1x128xf32>
    %83 = arith.mulf %82, %76 : vector<1x4x1x128xf32>
    %84 = arith.addf %81, %83 : vector<1x4x1x128xf32>
    %85 = vector.broadcast %35 : f32 to vector<1x4x1x128xf32>
    %86 = arith.mulf %84, %85 : vector<1x4x1x128xf32>
    %87 = tpu.iota {dimensions = array<i32: 2>} : vector<1x1x8x128xi32>
    %c0_39 = arith.constant 0 : index
    %c0_40 = arith.constant 0 : index
    %c0_41 = arith.constant 0 : index
    %88 = vector.load %arg4[%c0_39, %c0_40, %c0_41] : memref<3x128x128xf32, #tpu.memory_space<vmem>>, vector<1x128x128xf32>
    %89 = vector.shape_cast %88 : vector<1x128x128xf32> to vector<128x128xf32>
    %cst_42 = arith.constant dense<0.000000e+00> : vector<32x128xf32>
    %90 = tpu.matmul %23, %89, %cst_42 {dimension_numbers = #tpu.dot_dimension_numbers<[1], [0], [0], [1], [0, 0, 1, 1], [], []>, precision = #tpu.contract_precision<fp32>} : vector<32x128xf32>, vector<128x128xf32>, vector<32x128xf32> -> vector<32x128xf32>
    %91 = vector.shape_cast %90 : vector<32x128xf32> to vector<1x4x8x128xf32>
    %c0_i32_43 = arith.constant 0 : i32
    %92 = vector.broadcast %c0_i32_43 : i32 to vector<1x1x8x128xi32>
    %93 = arith.cmpi eq, %87, %92 : vector<1x1x8x128xi32>
    %c1_i32_44 = arith.constant 1 : i32
    %94 = tpu.dynamic_rotate %91 by %c1_i32_44 dim 2 : vector<1x4x8x128xf32>, i32 -> vector<1x4x8x128xf32>
    %95 = vector.shape_cast %93 : vector<1x1x8x128xi1> to vector<1x1x8x128xi1>
    %96 = vector.broadcast %95 : vector<1x1x8x128xi1> to vector<1x4x8x128xi1>
    %97 = vector.shape_cast %61 : vector<1x4x1x128xf32> to vector<1x4x1x128xf32>
    %98 = vector.broadcast %97 : vector<1x4x1x128xf32> to vector<1x4x8x128xf32>
    %99 = arith.select %96, %98, %94 : vector<1x4x8x128xi1>, vector<1x4x8x128xf32>
    %c1_45 = arith.constant 1 : index
    %c0_46 = arith.constant 0 : index
    %c0_47 = arith.constant 0 : index
    %100 = vector.load %arg4[%c1_45, %c0_46, %c0_47] : memref<3x128x128xf32, #tpu.memory_space<vmem>>, vector<1x128x128xf32>
    %101 = vector.shape_cast %100 : vector<1x128x128xf32> to vector<128x128xf32>
    %cst_48 = arith.constant dense<0.000000e+00> : vector<32x128xf32>
    %102 = tpu.matmul %23, %101, %cst_48 {dimension_numbers = #tpu.dot_dimension_numbers<[1], [0], [0], [1], [0, 0, 1, 1], [], []>, precision = #tpu.contract_precision<fp32>} : vector<32x128xf32>, vector<128x128xf32>, vector<32x128xf32> -> vector<32x128xf32>
    %103 = vector.shape_cast %102 : vector<32x128xf32> to vector<1x4x8x128xf32>
    %104 = arith.addf %99, %103 : vector<1x4x8x128xf32>
    %c2_49 = arith.constant 2 : index
    %c0_50 = arith.constant 0 : index
    %c0_51 = arith.constant 0 : index
    %105 = vector.load %arg4[%c2_49, %c0_50, %c0_51] : memref<3x128x128xf32, #tpu.memory_space<vmem>>, vector<1x128x128xf32>
    %106 = vector.shape_cast %105 : vector<1x128x128xf32> to vector<128x128xf32>
    %cst_52 = arith.constant dense<0.000000e+00> : vector<32x128xf32>
    %107 = tpu.matmul %23, %106, %cst_52 {dimension_numbers = #tpu.dot_dimension_numbers<[1], [0], [0], [1], [0, 0, 1, 1], [], []>, precision = #tpu.contract_precision<fp32>} : vector<32x128xf32>, vector<128x128xf32>, vector<32x128xf32> -> vector<32x128xf32>
    %108 = vector.shape_cast %107 : vector<32x128xf32> to vector<1x4x8x128xf32>
    %c7_i32 = arith.constant 7 : i32
    %109 = vector.broadcast %c7_i32 : i32 to vector<1x1x8x128xi32>
    %110 = arith.cmpi eq, %87, %109 : vector<1x1x8x128xi32>
    %c7_i32_53 = arith.constant 7 : i32
    %111 = tpu.dynamic_rotate %108 by %c7_i32_53 dim 2 : vector<1x4x8x128xf32>, i32 -> vector<1x4x8x128xf32>
    %112 = vector.shape_cast %110 : vector<1x1x8x128xi1> to vector<1x1x8x128xi1>
    %113 = vector.broadcast %112 : vector<1x1x8x128xi1> to vector<1x4x8x128xi1>
    %114 = vector.shape_cast %86 : vector<1x4x1x128xf32> to vector<1x4x1x128xf32>
    %115 = vector.broadcast %114 : vector<1x4x1x128xf32> to vector<1x4x8x128xf32>
    %116 = arith.select %113, %115, %111 : vector<1x4x8x128xi1>, vector<1x4x8x128xf32>
    %117 = arith.addf %104, %116 : vector<1x4x8x128xf32>
    %118 = vector.broadcast %22 : vector<1x1x8x128xf32> to vector<1x4x8x128xf32>
    %119 = arith.addf %117, %118 : vector<1x4x8x128xf32>
    %cst_54 = arith.constant 0.000000e+00 : f32
    %120 = vector.broadcast %cst_54 : f32 to vector<1x4x8x128xf32>
    %121 = arith.maximumf %119, %120 : vector<1x4x8x128xf32>
    %c0_55 = arith.constant 0 : index
    %c0_56 = arith.constant 0 : index
    %c0_57 = arith.constant 0 : index
    %c0_58 = arith.constant 0 : index
    %122 = vector.load %arg7[%c0_55, %c0_56, %c0_57, %c0_58] : memref<1x4x8x128xf32, #tpu.memory_space<vmem>>, vector<1x4x8x128xf32>
    tpu.vector_store %arg7[%c0_55, %c0_56, %c0_57, %c0_58], %121 {strides = array<i32>} : memref<1x4x8x128xf32, #tpu.memory_space<vmem>>, vector<1x4x8x128xf32>,
    return
  }
  func.func @transform_0(%arg0: i32, %arg1: i32) -> i32 {
    %c0_i32 = arith.constant 0 : i32
    %c0_i32_0 = arith.constant 0 : i32
    return %c0_i32 : i32
  }
  func.func @transform_1(%arg0: i32, %arg1: i32) -> i32 {
    %c0_i32 = arith.constant 0 : i32
    %c0_i32_0 = arith.constant 0 : i32
    return %c0_i32 : i32
  }
  func.func @transform_2(%arg0: i32, %arg1: i32) -> (i32, i32, i32) {
    %c0_i32 = arith.constant 0 : i32
    %c0_i32_0 = arith.constant 0 : i32
    %c0_i32_1 = arith.constant 0 : i32
    %c0_i32_2 = arith.constant 0 : i32
    return %c0_i32, %c0_i32_0, %c0_i32_1 : i32, i32, i32
  }
  func.func @transform_3(%arg0: i32, %arg1: i32) -> (i32, i32, i32, i32) {
    %c0_i32 = arith.constant 0 : i32
    %c0_i32_0 = arith.constant 0 : i32
    %c0_i32_1 = arith.constant 0 : i32
    return %arg0, %c0_i32, %arg1, %c0_i32_0 : i32, i32, i32, i32
  }
  func.func @transform_5(%arg0: i32, %arg1: i32) -> (i32, i32, i32, i32) {
    %c0_i32 = arith.constant 0 : i32
    %c0_i32_0 = arith.constant 0 : i32
    %c0_i32_1 = arith.constant 0 : i32
    return %arg0, %c0_i32, %arg1, %c0_i32_0 : i32, i32, i32, i32
  }
}

</mosaic_0001>

<bundles_post_ra>
// kernel: tpu_custom_call.1
= control target key start
LH: loop header
LB: loop body
LE: loop exit
PB: predicated region body
PF: predicated region fallthrough
CT: control target
= control target key end

     0   :  { %s6197_s0 = inlined_call_operand.vmem [shape: f32[9], index: 0, kind: input, shape index: {}]   ;;  %s6198_s1 = inlined_call_operand.<no memory space> [shape: f32[1], index: 1, kind: input, shape index: {}]   ;;  %s6199_s2 = inlined_call_operand.hbm [shape: f32[3,128,128], index: 2, kind: input, shape index: {}]   ;;  %s6200_s3 = inlined_call_operand.hbm [shape: f32[2,4,16,128], index: 3, kind: input, shape index: {}]   ;;  %s6201_s4 = inlined_call_operand.hbm [shape: f32[2,4,16,128], index: 4, kind: input, shape index: {}]   ;;  %s6202_s5 = inlined_call_operand.hbm [shape: f32[2,4,16,128], index: 5, kind: output, shape index: {}]  }
   0x1   :  { %6259 = sst [smem:[#allocation46_spill]] %s6197_s0 }
   0x2   :  { %6260 = sst [smem:[#allocation47_spill]] %s6199_s2 }
   0x3   :  { %6261 = sst [smem:[#allocation48_spill]] %s6200_s3 }
   0x4   :  { %10 = sst [smem:[#allocation5]] %s6198_s1 }
   0x5   :  { %11 = vsyncpa [#allocation9], 0 }
   0x6   :  { %12 = vsyncpa [#allocation7], 0 }
   0x7   :  { %13 = vsyncpa [#allocation12], 0 }
   0x8   :  { %15 = vsyncpa [#allocation12 + $0x1], 0 }
   0x9   :  { %16 = vsyncpa [#allocation8], 0 }
   0xa   :  { %18 = vsyncpa [#allocation8 + $0x1], 0  ;;  %s4478_s20 = smov 0   ;;  %s4480_s21 = smov 0  }
   0xb   :  { %s4482_s22 = smov 0   ;;  %s4484_s23 = smov 0  }
   0xc   :  { %s4486_s24 = smov 0   ;;  %s4488_s25 = smov 0  }
   0xd   :  { %s4490_s26 = smov 0   ;;  %s4492_s1 = smov 0  }
   0xe LB: > { %6262 = sst [smem:[#allocation22_spill]] %s4400_s20  ;;  %s3022_s27 = sadd.s32 4294967295, %s4428_s1   ;;  %s4428_s1 = sphi %s4492_s1, %s24_s1   ;;  %s4424_s26 = sphi %s4490_s26, %s6380_s26   ;;  %s4420_s25 = sphi %s4488_s25, %s6379_s25   ;;  %s4416_s24 = sphi %s4486_s24, %s6378_s24   ;;  %s4412_s23 = sphi %s4484_s23, %s6377_s23   ;;  %s4408_s22 = sphi %s4482_s22, %s6376_s22   ;;  %s4404_s21 = sphi %s4480_s21, %s6375_s21   ;;  %s4400_s20 = sphi %s4478_s20, %s6374_s20  }
   0xf   : > { %s3023_s28 = sadd.s32 4294967294, %s4428_s1   ;;  %p115_p0 = scmp.ne.s32.totalorder %s4408_s22, %s4404_s21 }
  0x10   : > { %p116_p1 = scmp.eq.s32.totalorder %s4428_s1, 0  ;;  %p121_p2 = scmp.ne.s32.totalorder %s4404_s21, %s4400_s20 }
  0x11   : > { %p4526_p3 = scmp.eq.s32.totalorder %s3022_s27, 0  ;;  %p147_p4 = scmp.eq.s32.totalorder %s3022_s27, 3 }
  0x12   : > { %p117_p5 = por %p116_p1, %p115_p0  ;;  %p153_p6 = scmp.eq.s32.totalorder %s3023_s28, 3 }
  0x13   : > { %s6263_s30 = scalar_select %p4526_p3, 1, 0 }
  0x14   : > { %p4532_p7 = por %p4526_p3, %p121_p2  ;;  %p4536_p8 = por %p147_p4, %p115_p0 }
  0x15   : > { %p4540_p9 = por %p153_p6, %p121_p2  ;;  %p3024_p10 = scmp.ge.s32.totalorder %s4428_s1, 1 }
  0x16   : > { %s6264_s6 = scalar_select %p4532_p7, 1, 0 }
  0x17   : > { %s6265_s7 = scalar_select %p4536_p8, 1, 0 }
  0x18   : > { %s6266_s8 = scalar_select %p4540_p9, 1, 0 }
  0x19   : > { %p160_p11 = scmp.lt.s32.totalorder %s4428_s1, 5  ;;  %s6268_s0 = sld [smem:[#allocation46_spill]] }
  0x1a   : > { %6267 = sst [smem:[#allocation23_spill]] %s6266_s8  ;;  %p4126_p13 = scmp.lt.s32.totalorder %s4428_s1, 4 }
  0x1b   : > { %p4549_p12 = pnand %p3024_p10, %p160_p11  ;;  %s4430_s14 = smov [#allocation10]  }
  0x1c   : > { %p4556_p1 = pnand %p4126_p13, %p117_p5  ;;  %s186_s15 = sshll.u32 %s4430_s14, 4  ;;  %s187_s15 = int_to_ptr.vmem [resolvable:$true] %s186_s15 }
  0x1d   : > { %s6269_s12 = scalar_select %p4549_p12, 1, 0 }
  0x1e   : > { %p4109_p0 = pneg %p4549_p12 }
  0x1f   : > { %s173_s11 = sshll.u32 %s6268_s0, 4  ;;  %s174_s11 = int_to_ptr.vmem [resolvable:$true] %s173_s11 }
  0x20   : > { %s6270_s13 = scalar_select %p4556_p1, 1, 0 }
  0x21   : > { %p4562_p2 = pnand %p4109_p0, %p4526_p3  ;;  %s4207_s17 = scalar_lea.vmem %s174_s11, 16 }
  0x22   : > { %p4208_p4 = scmp.ne.s32.totalorder %s174_s11, %s4207_s17  ;;  %p4215_p9 = scmp.lt.s32.totalorder %s174_s11, %s174_s11 }
  0x23   : > { %p4209_p6 = pneg %p4562_p2  ;;  %p4216_p5 = scmp.lt.s32.totalorder %s4207_s17, %s4207_s17 }
  0x25   : > { %p4210_p10 = pnand %p4209_p6, %p4208_p4  ;;  %p4217_p13 = por %p4216_p5, %p4215_p9 }
  0x27   : > { %p4211_p11 = pneg %p4210_p10 }
  0x29   : > { %p4218_p8 = pnand %p4217_p13, %p4211_p11 }
  0x2b   : > { %4221 = shalt.err (!%p4218_p8)
}
  0x2c   : > { %s4431_s18 = smov [#allocation6]   ;;  %s4233_s19 = scalar_lea.vmem %s187_s15, 6144 }
  0x2d   : > { %4112 = dma.vmem_to_smem (!%p4562_p2), %s174_s11, 16, %s4431_s18, [#allocation9]  }
  0x2e   : > { %p4234_p0 = scmp.ne.s32.totalorder %s187_s15, %s4233_s19  ;;  %p4241_p12 = scmp.lt.s32.totalorder %s187_s15, %s187_s15 }
  0x2f   : > { %p4242_p1 = scmp.lt.s32.totalorder %s4233_s19, %s4233_s19 }
  0x30   : > { %p4236_p7 = pnand %p4234_p0, %p4209_p6 }
  0x31   : > { %p4243_p4 = por %p4242_p1, %p4241_p12 }
  0x32   : > { %p4237_p3 = pneg %p4236_p7 }
  0x34   : > { %p4244_p10 = pnand %p4243_p4, %p4237_p3 }
  0x36   : > { %4247 = shalt.err (!%p4244_p10)
}
  0x37   : > { %s6210_s27 = smov 128   ;;  %s6211_s28 = smov 8  }
  0x38   : > { %s6272_s2 = sld [smem:[#allocation47_spill]]  ;;  %s33_s11 = sadd.s32 1, %s4420_s25 }
  0x39   : > { %s36_s14 = sadd.s32 1, %s4424_s26  ;;  %p34_p3 = scmp.ge.s32.totalorder %s33_s11, 2 }
  0x3a   : > { %s200_s17 = sand.u32 1, %s4408_s22   ;;  %s3029_s16 = sshll.u32 %s4424_s26, 3 }
  0x3b   : > { %s3028_s18 = sshll.u32 %s200_s17, 5  ;;  %s6382_s11 = smov (%p34_p3, %s33_s11), 0 }
  0x3c   : > { %6273 = sst [smem:[#allocation24_spill]] %s6382_s11  ;;  %s6384_s14 = smov (!%p34_p3, %s36_s14), %s4424_s26 }
  0x3d   : > { %s104_s19 = ssub.s32 %s4420_s25, %s6382_s11  ;;  %p38_p7 = scmp.ge.s32.totalorder %s6384_s14, 2 }
  0x3e   : > { %4115 = dma.hbm_to_vmem [thread:$0]  (!%p4562_p2), %s6272_s2, 6144, %s187_s15, [#allocation7], %s6210_s27, %s6210_s27, %s6211_s28  }
  0x3f   : > { %s209_s29 = sadd.s32 %s4420_s25, %s3029_s16  ;;  %s204_s0 = scalar_lea.vmem [#allocation11], %s3028_s18 }
  0x40   : > { %s212_s8 = sshll.u32 %s204_s0, 4  ;;  %s6386_s14 = smov (%p38_p7, %s6384_s14), 0  ;;  %s213_s8 = int_to_ptr.vmem [resolvable:$true] %s212_s8 }
  0x41   : > { %6274 = sst [smem:[#allocation25_spill]] %s6386_s14  ;;  %s3030_s15 = sshll.u32 %s209_s29, 7 }
  0x42   : > { %s103_s9 = ssub.s32 %s4424_s26, %s6386_s14  ;;  %s6275_s3 = sld [smem:[#allocation48_spill]] }
  0x43   : > { %s105_s2 = sor.u32 %s104_s19, %s103_s9  ;;  %s201_s20 = scalar_lea.sflag [#allocation12], %s200_s17 }
  0x44   : > { %p106_p8 = scmp.eq.s32.totalorder %s105_s2, 0  ;;  %p6276_p9 = scmp.ne.s32.totalorder %s6270_s13, 0 }
  0x45   : > { %s4261_s11 = scalar_lea.vmem %s213_s8, 512  ;;  %s4434_s0 = smov [#allocation11]  }
  0x46   : > { %p4250_p12 = pneg %p6276_p9  ;;  %p4262_p1 = scmp.ne.s32.totalorder %s213_s8, %s4261_s11 }
  0x47   : > { %s4266_s18 = sshll.u32 %s4434_s0, 4  ;;  %s4267_s18 = int_to_ptr.vmem [resolvable:$false] %s4266_s18 }
  0x48   : > { %s211_s28 = scalar_lea.hbm %s6275_s3, %s3030_s15  ;;  %p4264_p2 = pnand %p4262_p1, %p4250_p12 }
  0x49   : > { %s4268_s16 = scalar_lea.vmem %s4267_s18, 1024  ;;  %p4269_p11 = scmp.lt.s32.totalorder %s213_s8, %s4267_s18 }
  0x4a   : > { %p4265_p6 = pneg %p4264_p2  ;;  %p4270_p5 = scmp.lt.s32.totalorder %s4268_s16, %s4261_s11 }
  0x4c   : > { %p4271_p13 = por %p4270_p5, %p4269_p11 }
  0x4e   : > { %p4272_p0 = pnand %p4271_p13, %p4265_p6 }
  0x50   : > { %4275 = shalt.err (!%p4272_p0)
}
  0x51   : > { %s4435_s29 = smov 256   ;;  %s6277_s27 = smov 8  }
  0x52   : > { %s6278_s17 = smov 128   ;;  %s6279_s19 = sadd.s32 1, %s4408_s22 }
  0x53   : > { %4119 = dma.hbm_to_vmem [thread:$0]  (!%p6276_p9), %s211_s28, 512, %s213_s8, %s201_s20, %s4435_s29, %s6278_s17, %s6277_s27  }
  0x54   : > { %s4605_s15 = scalar_select %p106_p8, %s4408_s22, %s6279_s19  }
  0x55   : > { %p6280_p4 = scmp.ne.s32.totalorder %s6269_s12, 0 }
  0x57   : > { %224 = sbr.rel (%p6280_p4) target bundleno = 727 (0x2d7), region = 36 }
  0x5c   : > { %p6281_p10 = scmp.ne.s32.totalorder %s6263_s30, 0 }
  0x5e   : > { %4379 = dma.done.wait (%p6281_p10), [#allocation9], 16  }
  0x5f   : > { %4381 = vsyncadd (%p6281_p10), [#allocation9], 4294967280 }
  0x60   : > { %4383 = dma.done.wait (%p6281_p10), [#allocation7], 6144  }
  0x61   : > { %4385 = vsyncadd (%p6281_p10), [#allocation7], 4294961152  ;;  %s4618_s2 = sand.u32 1, %s4404_s21   ;;  %p6282_p3 = scmp.ne.s32.totalorder %s6264_s6, 0 }
  0x62   : > { %s6214_s20 = sshll.u32 %s4618_s2, 5  ;;  %s235_s8 = scalar_lea.sflag [#allocation12], %s4618_s2 }
  0x63   : > { %s4624_s12 = scalar_lea.vmem [#allocation11], %s6214_s20 }
  0x64   : > { %4387 = dma.done.wait (%p6282_p3), %s235_s8, 512  }
  0x65   : > { %4389 = vsyncadd (%p6282_p3), %s235_s8, 4294966784 }
  0x66   : > { %243 = sfence }
  0x67   : > { %s3036_s30 = sshll.u32 %s4412_s23, 3  ;;  %s3038_s11 = sshll.u32 %s4416_s24, 6 }
  0x68   : > { %s3037_s13 = sadd.s32 4294967295, %s3036_s30  ;;  %s268_s28 = sadd.s32 8, %s3036_s30 }
  0x69   : > { %p266_p7 = scmp.gt.s32.totalorder %s3037_s13, 0  ;;  %p269_p8 = scmp.lt.s32.totalorder %s268_s28, 15 }
  0x6a   : > { %s4436_s10 = smov [#allocation2]   ;;  %s4278_s8 = scalar_lea.hbm %s6201_s4, 2048 }
  0x6b   : > { %s6388_s13 = smov (!%p266_p7, %s3037_s13), 0  ;;  %s6390_s28 = smov (!%p269_p8, %s268_s28), 15 }
  0x6c   : > { %s272_s9 = sadd.s32 %s3038_s11, %s6388_s13  ;;  %s276_s0 = sshll.u32 %s4436_s10, 4  ;;  %s277_s0 = int_to_ptr.vmem [resolvable:$true] %s276_s0 }
  0x6d   : > { %s3039_s18 = sshll.u32 %s272_s9, 4 }
  0x6e   : > { %s274_s29 = scalar_lea.hbm %s6201_s4, %s3039_s18 }
  0x6f   : > { %s4276_s27 = scalar_lea.hbm %s274_s29, 64  ;;  %p4279_p12 = scmp.lt.s32.totalorder %s274_s29, %s6201_s4 }
  0x70   : > { %p4277_p9 = scmp.ne.s32.totalorder %s274_s29, %s4276_s27  ;;  %p4280_p1 = scmp.lt.s32.totalorder %s4278_s8, %s4276_s27 }
  0x72   : > { %p4281_p2 = por %p4280_p1, %p4279_p12 }
  0x74   : > { %p4282_p6 = pnand %p4281_p2, %p4277_p9 }
  0x76   : > { %4285 = shalt.err (!%p4282_p6)  }
  0x77   : > { %s4286_s13 = scalar_lea.vmem %s277_s0, 64  ;;  %p4291_p5 = scmp.lt.s32.totalorder %s277_s0, %s277_s0 }
  0x78   : > { %p4287_p11 = scmp.ne.s32.totalorder %s277_s0, %s4286_s13  ;;  %p4292_p13 = scmp.lt.s32.totalorder %s4286_s13, %s4286_s13 }
  0x7a   : > { %p4293_p0 = por %p4292_p13, %p4291_p5 }
  0x7c   : > { %p4294_p4 = pnand %p4293_p0, %p4287_p11 }
  0x7e   : > { %4297 = shalt.err (!%p4294_p4)  }
  0x7f   : > { %s4437_s9 = smov 256   ;;  %s4438_s10 = smov 16  }
  0x80   : > { %s4439_s18 = smov 1   ;;  %s280_s20 = sadd.s32 %s3038_s11, %s6390_s28 }
  0x81   : > { %279 = dma.hbm_to_vmem [thread:$0]  %s274_s29, 64, %s277_s0, [#allocation4], %s4437_s9, %s4438_s10, %s4439_s18 }
  0x82   : > { %s3040_s6 = sshll.u32 %s280_s20, 4  ;;  %s4440_s16 = smov [#allocation3]  }
  0x83   : > { %s285_s27 = sshll.u32 %s4440_s16, 4  ;;  %s282_s30 = scalar_lea.hbm %s6201_s4, %s3040_s6  ;;  %s286_s27 = int_to_ptr.vmem [resolvable:$true] %s285_s27 }
  0x84   : > { %s4298_s13 = scalar_lea.hbm %s282_s30, 64  ;;  %p4301_p3 = scmp.lt.s32.totalorder %s282_s30, %s6201_s4 }
  0x85   : > { %p4299_p10 = scmp.ne.s32.totalorder %s282_s30, %s4298_s13  ;;  %p4302_p7 = scmp.lt.s32.totalorder %s4278_s8, %s4298_s13 }
  0x87   : > { %p4303_p8 = por %p4302_p7, %p4301_p3 }
  0x89   : > { %p4304_p9 = pnand %p4303_p8, %p4299_p10 }
  0x8b   : > { %4307 = shalt.err (!%p4304_p9)  }
  0x8c   : > { %s4308_s0 = scalar_lea.vmem %s286_s27, 64  ;;  %p4313_p1 = scmp.lt.s32.totalorder %s286_s27, %s286_s27 }
  0x8d   : > { %p4309_p12 = scmp.ne.s32.totalorder %s286_s27, %s4308_s0  ;;  %p4314_p2 = scmp.lt.s32.totalorder %s4308_s0, %s4308_s0 }
  0x8f   : > { %p4315_p6 = por %p4314_p2, %p4313_p1 }
  0x91   : > { %p4316_p11 = pnand %p4315_p6, %p4309_p12 }
  0x93   : > { %4319 = shalt.err (!%p4316_p11)  }
  0x94   : > { %288 = dma.hbm_to_vmem [thread:$0]  %s282_s30, 64, %s286_s27, [#allocation4 + $0x1], %s4437_s9, %s4438_s10, %s4439_s18 }
  0x95   : > { %s4658_s3 = sld [smem:[#allocation6]]  ;;  %v4663_v0 = vld [vmem:[%s4624_s12] sm:$0xff]  ;;  %v4668_v1 = vld [vmem:[%s4624_s12 + $0x8] sm:$0xff]  ;;  %v4671_v2 = vld [vmem:[%s4624_s12 + $0x10] sm:$0xff]  ;;  %s6284_s20 = sshll.u32 %s4618_s2, 5 }
  0x96   : > { %s4660_s14 = sld [smem:[#allocation6 + $0x1]]  ;;  %v4674_v3 = vld [vmem:[%s4624_s12 + $0x18] sm:$0xff]  ;;  %v300_v4 = vmax.f32 %v4663_v0, %v4668_v1  ;;  %s4690_s12 = scalar_lea.vmem [#allocation13], %s6284_s20 }
  0x97   : > { %s4665_s28 = sld [smem:[#allocation6 + $0x2]]  ;;  %v301_v5 = vmax.f32 %v4671_v2, %v4674_v3 }
  0x98   : > { %s4676_s11 = sld [smem:[#allocation6 + $0x6]] }
  0x99   : > { %s4678_s29 = sld [smem:[#allocation6 + $0x7]]  ;;  %v302_v6 = vmax.f32 %v300_v4, %v301_v5 }
  0x9a   : > { %s4680_s8 = sld [smem:[#allocation6 + $0x8]] }
  0x9b   : > { %s295_s10 = sld [smem:[#allocation5]] }
  0xa1   : > { %v303_v7 = vstv %s295_s10 }
  0xa2   : > { %v4686_v8 = vadd.f32 %v303_v7, %v302_v6 }
  0xa4   : > { %6283 = vst [vmem:[#allocation26_spill] sm:$0xff] %v4686_v8 }
  0xa5   : > { %4390 = dma.done.wait [#allocation4], 64 }
  0xa6   : > { %4391 = vsyncadd [#allocation4], 4294967232 }
  0xa7   : > { %4392 = dma.done.wait [#allocation4 + $0x1], 64 }
  0xa8   : > { %4393 = vsyncadd [#allocation4 + $0x1], 4294967232  ;;  %v4693_v9 = vand.u32 4294901760, %v4663_v0  ;;  %v455_v10 = vld [vmem:[#allocation10 + $0x78] sm:$0xff]  ;;  %v454_v11 = vld [vmem:[#allocation10 + $0x70] sm:$0xff]  ;;  %s4441_s6 = smov 127  }
  0xa9   : > { %v453_v12 = vld [vmem:[#allocation10 + $0x68] sm:$0xff]  ;;  %v4696_v13 = vand.u32 4294901760, %v455_v10  ;;  %v4698_v14 = vand.u32 4294901760, %v454_v11  ;;  %v452_v16 = vld [vmem:[#allocation10 + $0x60] sm:$0xff]  ;;  %v451_v17 = vld [vmem:[#allocation10 + $0x58] sm:$0xff]  ;;  %p312_p5 = scmp.gt.s32.totalorder %s4412_s23, 0 }
  0xaa   : > { %6285 = vst [vmem:[#allocation27_spill] sm:$0xff] %v4693_v9  ;;  %3483 = vmatprep.mubr.f32.mxu1 %v4693_v9  ;;  %v4700_v15 = vand.u32 4294901760, %v453_v12  ;;  %v450_v18 = vld [vmem:[#allocation10 + $0x50] sm:$0xff]  ;;  %v4702_v19 = vand.u32 4294901760, %v452_v16  ;;  %v4704_v20 = vand.u32 4294901760, %v451_v17  ;;  %v449_v22 = vld [vmem:[#allocation10 + $0x48] sm:$0xff] }
  0xab   : > { %v4706_v21 = vand.u32 4294901760, %v450_v18  ;;  %v448_v23 = vld [vmem:[#allocation10 + $0x40] sm:$0xff]  ;;  %3413 = vmatprep.subr.mxu0 %v4696_v13  ;;  %v4710_v24 = vsub.f32 %v455_v10, %v4696_v13  ;;  %v4713_v25 = vsub.f32 %v454_v11, %v4698_v14  ;;  %v4715_v26 = vand.u32 4294901760, %v449_v22  ;;  %v447_v28 = vld [vmem:[#allocation10 + $0x38] sm:$0xff]  ;;  %v446_v35 = vld [vmem:[#allocation10 + $0x30] sm:$0xff]  ;;  %p315_p13 = scmp.lt.s32.totalorder %s4412_s23, 1 }
  0xac   : > { %v4718_v27 = vsub.f32 %v453_v12, %v4700_v15  ;;  %3414 = vmatpush3.msra.mxu0 %v4696_v13  ;;  %v4722_v29 = vsub.f32 %v452_v16, %v4702_v19  ;;  %v4725_v30 = vsub.f32 %v451_v17, %v4704_v20  ;;  %v4737_v34 = vand.u32 4294901760, %v448_v23  ;;  %v445_v45 = vld [vmem:[#allocation10 + $0x28] sm:$0xff]  ;;  %v444_v50 = vld [vmem:[#allocation10 + $0x20] sm:$0xff]  ;;  %v443_v58 = vld [vmem:[#allocation10 + $0x18] sm:$0xff]  ;;  %s3047_s19 = sshll.u32 %s4416_s24, 3  ;;  %s2889_s13 = sshll.u32 %s4690_s12, 4  ;;  %s6141_s13 = int_to_ptr.vmem [resolvable:$true] %s2889_s13 }
  0xad   : > { %3415 = vmatprep.subr.mxu0 %v4698_v14  ;;  %v4729_v31 = vand.u32 4294901760, %v4710_v24  ;;  %v4732_v32 = vand.u32 4294901760, %v4713_v25  ;;  %v4743_v37 = vand.u32 4294901760, %v447_v28  ;;  %v4749_v39 = vsub.f32 %v450_v18, %v4706_v21  ;;  %v442_v7 = vld [vmem:[#allocation10 + $0x10] sm:$0xff]  ;;  %v441_v18 = vld [vmem:[#allocation10 + $0x8] sm:$0xff]  ;;  %s2886_s24 = sadd.s32 %s4412_s23, %s3047_s19  ;;  %p6368_p4 = scmp.ne.s32.totalorder %s6265_s7, 0 }
  0xae   : > { %v4735_v33 = vand.u32 4294901760, %v4718_v27  ;;  %3416 = vmatpush3.msra.mxu0 %v4698_v14  ;;  %v4741_v36 = vand.u32 4294901760, %v4722_v29  ;;  %v4746_v38 = vand.u32 4294901760, %v4725_v30  ;;  %v4759_v43 = vsub.f32 %v449_v22, %v4715_v26  ;;  %s6032_s27 = scalar_select %p315_p13, 1, 0 }
  0xaf   : > { %3417 = vmatprep.subr.mxu0 %v4700_v15  ;;  %v581_v40 = vsub.f32 %v4710_v24, %v4729_v31  ;;  %v588_v41 = vsub.f32 %v4713_v25, %v4732_v32  ;;  %v4762_v44 = vand.u32 4294901760, %v446_v35  ;;  %v4768_v49 = vand.u32 4294901760, %v4749_v39  ;;  %s3048_s30 = sshll.u32 %s2886_s24, 7 }
  0xb0   : > { %v595_v42 = vsub.f32 %v4718_v27, %v4735_v33  ;;  %3418 = vmatpush3.msra.mxu0 %v4700_v15  ;;  %v602_v48 = vsub.f32 %v4722_v29, %v4741_v36  ;;  %v609_v51 = vsub.f32 %v4725_v30, %v4746_v38  ;;  %v4774_v52 = vsub.f32 %v448_v23, %v4737_v34  ;;  %s317_s17 = scvt.s32.f32 %s6032_s27 }
  0xb1   : > { %3419 = vmatprep.subr.mxu0 %v4702_v19  ;;  %v582_v46 = vand.u32 4294901760, %v581_v40  ;;  %v589_v47 = vand.u32 4294901760, %v588_v41  ;;  %v4777_v54 = vand.u32 4294901760, %v445_v45  ;;  %v4780_v55 = vand.u32 4294901760, %v4759_v43 }
  0xb2   : > { %3420 = vmatpush3.msra.mxu0 %v4702_v19  ;;  %v596_v53 = vand.u32 4294901760, %v595_v42  ;;  %v4783_v56 = vsub.f32 %v447_v28, %v4743_v37  ;;  %v4786_v57 = vand.u32 4294901760, %v444_v50  ;;  %v603_v59 = vand.u32 4294901760, %v602_v48  ;;  %v440_v42 = vld [vmem:[#allocation10] sm:$0xff] }
  0xb3   : > { %3421 = vmatprep.subr.mxu0 %v4704_v20  ;;  %3451 = vmatprep.subr.mxu1 %v582_v46  ;;  %v616_v60 = vsub.f32 %v4749_v39, %v4768_v49  ;;  %v4792_v61 = vand.u32 4294901760, %v4774_v52  ;;  %v4795_v62 = vsub.f32 %v446_v35, %v4762_v44  ;;  %v610_v63 = vand.u32 4294901760, %v609_v51 }
  0xb4   : > { %3422 = vmatpush3.msra.mxu0 %v4704_v20  ;;  %3452 = vmatpush3.msra.mxu1 %v582_v46  ;;  %v623_v4 = vsub.f32 %v4759_v43, %v4780_v55  ;;  %v4801_v5 = vand.u32 4294901760, %v443_v58  ;;  %v4804_v6 = vand.u32 4294901760, %v4783_v56  ;;  %v4807_v10 = vsub.f32 %v445_v45, %v4777_v54 }
  0xb5   : > { %3423 = vmatprep.subr.mxu0 %v4706_v21  ;;  %3453 = vmatprep.subr.mxu1 %v589_v47  ;;  %v4811_v11 = vand.u32 4294901760, %v4668_v1  ;;  %v617_v12 = vand.u32 4294901760, %v616_v60  ;;  %v630_v16 = vsub.f32 %v4774_v52, %v4792_v61  ;;  %v4817_v17 = vand.u32 4294901760, %v4795_v62 }
  0xb6   : > { %3424 = vmatpush3.msra.mxu0 %v4706_v21  ;;  %3454 = vmatpush3.msra.mxu1 %v589_v47  ;;  %v4820_v22 = vsub.f32 %v444_v50, %v4786_v57  ;;  %v4823_v23 = vand.u32 4294901760, %v442_v7  ;;  %v4827_v28 = vsub.f32 %v4663_v0, %v4693_v9  ;;  %v624_v35 = vand.u32 4294901760, %v623_v4 }
  0xb7   : > { %3425 = vmatprep.subr.mxu0 %v4715_v26  ;;  %3455 = vmatprep.subr.mxu1 %v596_v53  ;;  %v637_v40 = vsub.f32 %v4783_v56, %v4804_v6  ;;  %v4833_v41 = vand.u32 4294901760, %v4807_v10  ;;  %v4836_v45 = vsub.f32 %v443_v58, %v4801_v5  ;;  %v4839_v46 = vand.u32 4294901760, %v441_v18 }
  0xb8   : > { %3426 = vmatpush3.msra.mxu0 %v4715_v26  ;;  %3456 = vmatpush3.msra.mxu1 %v596_v53  ;;  %v4843_v0 = vsub.f32 %v4668_v1, %v4811_v11  ;;  %v631_v47 = vand.u32 4294901760, %v630_v16  ;;  %v644_v48 = vsub.f32 %v4795_v62, %v4817_v17  ;;  %v4849_v50 = vand.u32 4294901760, %v4820_v22 }
  0xb9   : > { %3427 = vmatprep.subr.mxu0 %v4737_v34  ;;  %3457 = vmatprep.subr.mxu1 %v603_v59  ;;  %v4852_v51 = vand.u32 4294901760, %v440_v42  ;;  %v4855_v53 = vsub.f32 %v442_v7, %v4823_v23  ;;  %v638_v1 = vand.u32 4294901760, %v637_v40  ;;  %v651_v58 = vsub.f32 %v4807_v10, %v4833_v41 }
  0xba   : > { %3428 = vmatpush3.msra.mxu0 %v4737_v34  ;;  %3458 = vmatpush3.msra.mxu1 %v603_v59  ;;  %6286 = vst [vmem:[#allocation28_spill] sm:$0xff] %v4849_v50  ;;  %v4861_v59 = vand.u32 4294901760, %v4827_v28  ;;  %v4864_v60 = vand.u32 4294901760, %v4836_v45  ;;  %v4871_v4 = vsub.f32 %v441_v18, %v4839_v46  ;;  %v645_v7 = vand.u32 4294901760, %v644_v48 }
  0xbb   : > { %3429 = vmatprep.subr.mxu0 %v4743_v37  ;;  %3459 = vmatprep.subr.mxu1 %v610_v63  ;;  %v4878_v16 = vand.u32 4294901760, %v4855_v53  ;;  %v652_v18 = vand.u32 4294901760, %v651_v58 }
  0xbc   : > { %3430 = vmatpush3.msra.mxu0 %v4743_v37  ;;  %3460 = vmatpush3.msra.mxu1 %v610_v63  ;;  %6287 = vst [vmem:[#allocation29_spill] sm:$0xff] %v4864_v60  ;;  %v4868_v63 = vand.u32 4294901760, %v4843_v0  ;;  %v540_v40 = vsub.f32 %v4827_v28, %v4861_v59  ;;  %v665_v48 = vsub.f32 %v4836_v45, %v4864_v60  ;;  %v4892_v8 = vand.u32 4294901760, %v4871_v4 }
  0xbd   : > { %3431 = vmatprep.subr.mxu0 %v4762_v44  ;;  %3461 = vmatprep.subr.mxu1 %v617_v12  ;;  %v672_v58 = vsub.f32 %v4855_v53, %v4878_v16 }
  0xbe   : > { %3432 = vmatpush3.msra.mxu0 %v4762_v44  ;;  %3462 = vmatpush3.msra.mxu1 %v617_v12  ;;  %v658_v12 = vsub.f32 %v4820_v22, %v4849_v50  ;;  %v666_v60 = vand.u32 4294901760, %v665_v48 }
  0xbf   : > { %3433 = vmatprep.subr.mxu0 %v4777_v54  ;;  %3463 = vmatprep.subr.mxu1 %v624_v35 }
  0xc0   : > { %3434 = vmatpush3.msra.mxu0 %v4777_v54  ;;  %3464 = vmatpush3.msra.mxu1 %v624_v35  ;;  %v4881_v35 = vsub.f32 %v440_v42, %v4852_v51  ;;  %v659_v42 = vand.u32 4294901760, %v658_v12  ;;  %v673_v12 = vand.u32 4294901760, %v672_v58 }
  0xc1   : > { %3435 = vmatprep.subr.mxu0 %v4786_v57  ;;  %3465 = vmatprep.subr.mxu1 %v631_v47 }
  0xc2   : > { %3436 = vmatpush3.msra.mxu0 %v4786_v57  ;;  %3466 = vmatpush3.msra.mxu1 %v631_v47  ;;  %v550_v47 = vsub.f32 %v4843_v0, %v4868_v63  ;;  %v4899_v9 = vand.u32 4294901760, %v4881_v35 }
  0xc3   : > { %3437 = vmatprep.subr.mxu0 %v4801_v5  ;;  %3467 = vmatprep.subr.mxu1 %v638_v1 }
  0xc4   : > { %3438 = vmatpush3.msra.mxu0 %v4801_v5  ;;  %3468 = vmatpush3.msra.mxu1 %v638_v1  ;;  %v4902_v1 = vand.u32 4294901760, %v540_v40  ;;  %v4905_v50 = vand.u32 4294901760, %v550_v47  ;;  %v686_v40 = vsub.f32 %v4881_v35, %v4899_v9 }
  0xc5   : > { %3439 = vmatprep.subr.mxu0 %v4823_v23  ;;  %3469 = vmatprep.subr.mxu1 %v645_v7 }
  0xc6   : > { %3440 = vmatpush3.msra.mxu0 %v4823_v23  ;;  %3470 = vmatpush3.msra.mxu1 %v645_v7  ;;  %v679_v7 = vsub.f32 %v4871_v4, %v4892_v8  ;;  %v687_v48 = vand.u32 4294901760, %v686_v40 }
  0xc7   : > { %3441 = vmatprep.subr.mxu0 %v4839_v46  ;;  %3471 = vmatprep.subr.mxu1 %v652_v18 }
  0xc8   : > { %3442 = vmatpush3.msra.mxu0 %v4839_v46  ;;  %3472 = vmatpush3.msra.mxu1 %v652_v18  ;;  %v680_v18 = vand.u32 4294901760, %v679_v7 }
  0xc9   : > { %3443 = vmatprep.subr.mxu0 %v4852_v51  ;;  %3473 = vmatprep.subr.mxu1 %v659_v42 }
  0xca   : > { %3444 = vmatpush3.msra.mxu0 %v4852_v51  ;;  %3474 = vmatpush3.msra.mxu1 %v659_v42 }
  0xcb   : > { %3445 = vmatprep.mubr.f32.mxu0 %v4902_v1  ;;  %3475 = vmatprep.subr.mxu1 %v666_v60 }
  0xcc   : > { %3489 = vmatprep.subr.mxu0 %v4710_v24  ;;  %3446 = vmatmul.mubr.f32.vlgmr.msra.gmra.mxu0 %v4905_v50 }
  0xcd   : > { %3476 = vmatpush3.msra.mxu1 %v666_v60  ;;  %3490 = vmatpush3.msra.mxu0 %v4710_v24  ;;  %v4924_v24 = vand.u32 4294901760, %v4671_v2  ;;  %v1260_v60 = vld [vmem:[#allocation10 + $0xb0] sm:$0xff] }
  0xce   : > { %3477 = vmatprep.subr.mxu1 %v673_v12  ;;  %3491 = vmatprep.subr.mxu0 %v4713_v25  ;;  %v5161_v58 = vand.u32 4294901760, %v1260_v60 }
  0xcf   : > { %3478 = vmatpush3.msra.mxu1 %v673_v12  ;;  %3492 = vmatpush3.msra.mxu0 %v4713_v25  ;;  %v4931_v25 = vand.u32 4294901760, %v4674_v3  ;;  %v1258_v12 = vld [vmem:[#allocation10 + $0xa0] sm:$0xff] }
  0xd0   : > { %3479 = vmatprep.subr.mxu1 %v680_v18  ;;  %3493 = vmatprep.subr.mxu0 %v4718_v27 }
  0xd1   : > { %3480 = vmatpush3.msra.mxu1 %v680_v18  ;;  %3494 = vmatpush3.msra.mxu0 %v4718_v27  ;;  %v4939_v27 = vsub.f32 %v4671_v2, %v4924_v24 }
  0xd2   : > { %3481 = vmatprep.subr.mxu1 %v687_v48  ;;  %3495 = vmatprep.subr.mxu0 %v4722_v29 }
  0xd3   : > { %3482 = vmatpush3.msra.mxu1 %v687_v48  ;;  %3496 = vmatpush3.msra.mxu0 %v4722_v29  ;;  %v4947_v29 = vsub.f32 %v4674_v3, %v4931_v25  ;;  %v4954_v2 = vand.u32 4294901760, %v4939_v27 }
  0xd4   : > { %3484 = vmatmul.mubr.f32.vlgmr.msra.gmra.mxu1 %v4811_v11  ;;  %3497 = vmatprep.subr.mxu0 %v4725_v30 }
  0xd5   : > { %3527 = vmatprep.subr.mxu1 %v4696_v13  ;;  %3498 = vmatpush3.msra.mxu0 %v4725_v30  ;;  %6288 = vst [vmem:[#allocation30_spill] sm:$0xff] %v4954_v2  ;;  %v4961_v3 = vand.u32 4294901760, %v4947_v29  ;;  %v560_v30 = vsub.f32 %v4939_v27, %v4954_v2 }
  0xd6   : > { %3528 = vmatpush3.msra.mxu1 %v4696_v13  ;;  %3499 = vmatprep.subr.mxu0 %v4749_v39 }
  0xd7   : > { %3529 = vmatprep.subr.mxu1 %v4698_v14  ;;  %3500 = vmatpush3.msra.mxu0 %v4749_v39  ;;  %6289 = vst [vmem:[#allocation31_spill] sm:$0xff] %v4961_v3  ;;  %v570_v39 = vsub.f32 %v4947_v29, %v4961_v3 }
  0xd8   : > { %3530 = vmatpush3.msra.mxu1 %v4698_v14  ;;  %3501 = vmatprep.subr.mxu0 %v4759_v43 }
  0xd9   : > { %3531 = vmatprep.subr.mxu1 %v4700_v15  ;;  %3502 = vmatpush3.msra.mxu0 %v4759_v43  ;;  %v4979_v43 = vand.u32 4294901760, %v560_v30 }
  0xda   : > { %3532 = vmatpush3.msra.mxu1 %v4700_v15  ;;  %3503 = vmatprep.subr.mxu0 %v4774_v52 }
  0xdb   : > { %3533 = vmatprep.subr.mxu1 %v4702_v19  ;;  %3504 = vmatpush3.msra.mxu0 %v4774_v52  ;;  %v4985_v52 = vand.u32 4294901760, %v570_v39 }
  0xdc   : > { %3534 = vmatpush3.msra.mxu1 %v4702_v19  ;;  %3505 = vmatprep.subr.mxu0 %v4783_v56 }
  0xdd   : > { %3535 = vmatprep.subr.mxu1 %v4704_v20  ;;  %3506 = vmatpush3.msra.mxu0 %v4783_v56 }
  0xde   : > { %3536 = vmatpush3.msra.mxu1 %v4704_v20  ;;  %3507 = vmatprep.subr.mxu0 %v4795_v62 }
  0xdf   : > { %3537 = vmatprep.subr.mxu1 %v4706_v21  ;;  %3508 = vmatpush3.msra.mxu0 %v4795_v62  ;;  %v1262_v62 = vld [vmem:[#allocation10 + $0xc0] sm:$0xff] }
  0xe0   : > { %3538 = vmatpush3.msra.mxu1 %v4706_v21  ;;  %3509 = vmatprep.subr.mxu0 %v4807_v10 }
  0xe1   : > { %3539 = vmatprep.subr.mxu1 %v4715_v26  ;;  %3510 = vmatpush3.msra.mxu0 %v4807_v10 }
  0xe2   : > { %3540 = vmatpush3.msra.mxu1 %v4715_v26  ;;  %3511 = vmatprep.subr.mxu0 %v4820_v22 }
  0xe3   : > { %3541 = vmatprep.subr.mxu1 %v4737_v34  ;;  %3512 = vmatpush3.msra.mxu0 %v4820_v22  ;;  %v1261_v22 = vld [vmem:[#allocation10 + $0xb8] sm:$0xff] }
  0xe4   : > { %3542 = vmatpush3.msra.mxu1 %v4737_v34  ;;  %3513 = vmatprep.subr.mxu0 %v4836_v45 }
  0xe5   : > { %3543 = vmatprep.subr.mxu1 %v4743_v37  ;;  %3514 = vmatpush3.msra.mxu0 %v4836_v45 }
  0xe6   : > { %3544 = vmatpush3.msra.mxu1 %v4743_v37  ;;  %3515 = vmatprep.subr.mxu0 %v4855_v53 }
  0xe7   : > { %3545 = vmatprep.subr.mxu1 %v4762_v44  ;;  %3448 = vmatprep.mubr.f32.mxu0 %v4979_v43 }
  0xe8   : > { %3516 = vmatpush3.msra.mxu0 %v4855_v53  ;;  %3546 = vmatpush3.msra.mxu1 %v4762_v44 }
  0xe9   : > { %3449 = vmatmul.mubr.f32.gmra.mxu0 %v4985_v52  ;;  %3517 = vmatprep.subr.mxu0 %v4871_v4 }
  0xea   : > { %3547 = vmatprep.subr.mxu1 %v4777_v54  ;;  %3518 = vmatpush3.msra.mxu0 %v4871_v4  ;;  %v5147_v4 = vand.u32 4294901760, %v1261_v22 }
  0xeb   : > { %3548 = vmatpush3.msra.mxu1 %v4777_v54  ;;  %3519 = vmatprep.subr.mxu0 %v4881_v35 }
  0xec   : > { %3549 = vmatprep.subr.mxu1 %v4786_v57  ;;  %3520 = vmatpush3.msra.mxu0 %v4881_v35  ;;  %v1259_v35 = vld [vmem:[#allocation10 + $0xa8] sm:$0xff] }
  0xed   : > { %3521 = vmatprep.mubr.f32.mxu0 %v4827_v28  ;;  %3550 = vmatpush3.msra.mxu1 %v4786_v57  ;;  %v5170_v18 = vand.u32 4294901760, %v1259_v35 }
  0xee   : > { %3486 = vmatprep.mubr.f32.mxu1 %v4924_v24  ;;  %3522 = vmatmul.mubr.f32.vlgmr.msra.gmra.mxu0 %v4843_v0 }
  0xef   : > { %3551 = vmatprep.subr.mxu1 %v4801_v5  ;;  %3565 = vmatprep.subr.mxu0 %v4729_v31 }
  0xf0   : > { %3487 = vmatmul.mubr.f32.gmra.mxu1 %v4931_v25  ;;  %3566 = vmatpush3.msra.mxu0 %v4729_v31  ;;  %v1266_v31 = vld [vmem:[#allocation10 + $0xe0] sm:$0xff] }
  0xf1   : > { %3552 = vmatpush3.msra.mxu1 %v4801_v5  ;;  %3567 = vmatprep.subr.mxu0 %v4732_v32 }
  0xf2   : > { %3553 = vmatprep.subr.mxu1 %v4823_v23  ;;  %3524 = vmatprep.mubr.f32.mxu0 %v4939_v27 }
  0xf3   : > { %3554 = vmatpush3.msra.mxu1 %v4823_v23  ;;  %3568 = vmatpush3.msra.mxu0 %v4732_v32 }
  0xf4   : > { %3525 = vmatmul.mubr.f32.gmra.mxu0 %v4947_v29  ;;  %3555 = vmatprep.subr.mxu1 %v4839_v46 }
  0xf5   : > { %3569 = vmatprep.subr.mxu0 %v4735_v33  ;;  %3556 = vmatpush3.msra.mxu1 %v4839_v46 }
  0xf6   : > { %3570 = vmatpush3.msra.mxu0 %v4735_v33  ;;  %3557 = vmatprep.subr.mxu1 %v4852_v51 }
  0xf7   : > { %3571 = vmatprep.subr.mxu0 %v4741_v36  ;;  %3558 = vmatpush3.msra.mxu1 %v4852_v51 }
  0xf8   : > { %3559 = vmatprep.mubr.f32.mxu1 %v4861_v59  ;;  %3572 = vmatpush3.msra.mxu0 %v4741_v36 }
  0xf9   : > { %3560 = vmatmul.mubr.f32.vlgmr.msra.gmra.mxu1 %v4868_v63  ;;  %3573 = vmatprep.subr.mxu0 %v4746_v38 }
  0xfa   : > { %3603 = vmatprep.subr.mxu1 %v4696_v13  ;;  %3574 = vmatpush3.msra.mxu0 %v4746_v38  ;;  %v6292_v38 = vld [vmem:[#allocation27_spill] sm:$0xff] }
  0xfb   : > { %3604 = vmatpush3.msra.mxu1 %v4696_v13  ;;  %3575 = vmatprep.subr.mxu0 %v4768_v49  ;;  %v1269_v13 = vld [vmem:[#allocation10 + $0xf8] sm:$0xff] }
  0xfc   : > { %3605 = vmatprep.subr.mxu1 %v4698_v14  ;;  %3562 = vmatprep.mubr.f32.mxu1 %v4954_v2 }
  0xfd   : > { %3576 = vmatpush3.msra.mxu0 %v4768_v49  ;;  %3606 = vmatpush3.msra.mxu1 %v4698_v14  ;;  %v6290_v14 = vld [vmem:[#allocation28_spill] sm:$0xff] }
  0xfe   : > { %3563 = vmatmul.mubr.f32.gmra.mxu1 %v4961_v3  ;;  %3577 = vmatprep.subr.mxu0 %v4780_v55 }
  0xff   : > { %3607 = vmatprep.subr.mxu1 %v4700_v15  ;;  %3578 = vmatpush3.msra.mxu0 %v4780_v55  ;;  %v1263_v55 = vld [vmem:[#allocation10 + $0xc8] sm:$0xff] }
 0x100   : > { %3608 = vmatpush3.msra.mxu1 %v4700_v15  ;;  %3579 = vmatprep.subr.mxu0 %v4792_v61  ;;  %v1268_v15 = vld [vmem:[#allocation10 + $0xf0] sm:$0xff] }
 0x101   : > { %3609 = vmatprep.subr.mxu1 %v4702_v19  ;;  %3580 = vmatpush3.msra.mxu0 %v4792_v61 }
 0x102   : > { %3610 = vmatpush3.msra.mxu1 %v4702_v19  ;;  %3581 = vmatprep.subr.mxu0 %v4804_v6  ;;  %v6291_v19 = vld [vmem:[#allocation29_spill] sm:$0xff] }
 0x103   : > { %3611 = vmatprep.subr.mxu1 %v4704_v20  ;;  %3582 = vmatpush3.msra.mxu0 %v4804_v6 }
 0x104   : > { %3612 = vmatpush3.msra.mxu1 %v4704_v20  ;;  %3583 = vmatprep.subr.mxu0 %v4817_v17  ;;  %v5061_v20 = vand.u32 4294901760, %v1269_v13 }
 0x105   : > { %3613 = vmatprep.subr.mxu1 %v4706_v21  ;;  %3584 = vmatpush3.msra.mxu0 %v4817_v17 }
 0x106   : > { %3614 = vmatpush3.msra.mxu1 %v4706_v21  ;;  %3585 = vmatprep.subr.mxu0 %v4833_v41  ;;  %v5067_v21 = vand.u32 4294901760, %v1268_v15  ;;  %v5074_v32 = vsub.f32 %v1269_v13, %v5061_v20  ;;  %v1257_v13 = vld [vmem:[#allocation10 + $0x98] sm:$0xff] }
 0x107   : > { %3615 = vmatprep.subr.mxu1 %v4715_v26  ;;  %3586 = vmatpush3.msra.mxu0 %v4833_v41 }
 0x108   : > { %3616 = vmatpush3.msra.mxu1 %v4715_v26  ;;  %3587 = vmatprep.subr.mxu0 %v6290_v14  ;;  %v1267_v26 = vld [vmem:[#allocation10 + $0xe8] sm:$0xff]  ;;  %v5083_v36 = vsub.f32 %v1268_v15, %v5067_v21  ;;  %v5182_v15 = vand.u32 4294901760, %v1258_v12 }
 0x109   : > { %3617 = vmatprep.subr.mxu1 %v4737_v34  ;;  %3588 = vmatpush3.msra.mxu0 %v6290_v14  ;;  %v5078_v33 = vand.u32 4294901760, %v1267_v26  ;;  %v5179_v14 = vsub.f32 %v1261_v22, %v5147_v4  ;;  %v1255_v22 = vld [vmem:[#allocation10 + $0x88] sm:$0xff] }
 0x10a   : > { %3618 = vmatpush3.msra.mxu1 %v4737_v34  ;;  %3589 = vmatprep.subr.mxu0 %v6291_v19  ;;  %v1265_v34 = vld [vmem:[#allocation10 + $0xd8] sm:$0xff] }
 0x10b   : > { %3619 = vmatprep.subr.mxu1 %v4743_v37  ;;  %3590 = vmatpush3.msra.mxu0 %v6291_v19  ;;  %v5096_v49 = vand.u32 4294901760, %v1265_v34 }
 0x10c   : > { %3620 = vmatpush3.msra.mxu1 %v4743_v37  ;;  %3591 = vmatprep.subr.mxu0 %v4878_v16  ;;  %v5087_v37 = vand.u32 4294901760, %v1266_v31 }
 0x10d   : > { %3621 = vmatprep.subr.mxu1 %v4762_v44  ;;  %3592 = vmatpush3.msra.mxu0 %v4878_v16  ;;  %v5125_v10 = vsub.f32 %v1265_v34, %v5096_v49  ;;  %v1256_v34 = vld [vmem:[#allocation10 + $0x90] sm:$0xff] }
 0x10e   : > { %3622 = vmatpush3.msra.mxu1 %v4762_v44  ;;  %3593 = vmatprep.subr.mxu0 %v4892_v8  ;;  %v1264_v44 = vld [vmem:[#allocation10 + $0xd0] sm:$0xff] }
 0x10f   : > { %3623 = vmatprep.subr.mxu1 %v4777_v54  ;;  %3594 = vmatpush3.msra.mxu0 %v4892_v8  ;;  %v5092_v8 = vand.u32 4294901760, %v5074_v32  ;;  %v5108_v56 = vand.u32 4294901760, %v1264_v44  ;;  %v5150_v16 = vand.u32 4294901760, %v5125_v10 }
 0x110   : > { %3624 = vmatpush3.msra.mxu1 %v4777_v54  ;;  %3595 = vmatprep.subr.mxu0 %v4899_v9  ;;  %v5099_v54 = vsub.f32 %v1267_v26, %v5078_v33 }
 0x111   : > { %3625 = vmatprep.subr.mxu1 %v4786_v57  ;;  %3596 = vmatpush3.msra.mxu0 %v4899_v9  ;;  %v5104_v9 = vand.u32 4294901760, %v5083_v36  ;;  %v1395_v61 = vsub.f32 %v5074_v32, %v5092_v8  ;;  %v5139_v45 = vsub.f32 %v1264_v44, %v5108_v56  ;;  %v1423_v30 = vsub.f32 %v5125_v10, %v5150_v16 }
 0x112   : > { %3597 = vmatprep.mubr.f32.mxu0 %v6292_v38  ;;  %3626 = vmatpush3.msra.mxu1 %v4786_v57  ;;  %v5111_v57 = vsub.f32 %v1266_v31, %v5087_v37  ;;  %v5122_v6 = vand.u32 4294901760, %v5099_v54  ;;  %v5191_v44 = vsub.f32 %v1260_v60, %v5161_v58  ;;  %v5207_v60 = vand.u32 4294901760, %v1256_v34 }
 0x113   : > { %3598 = vmatmul.mubr.f32.vlgmr.msra.gmra.mxu0 %v4811_v11  ;;  %3627 = vmatprep.subr.mxu1 %v4801_v5  ;;  %v1402_v17 = vsub.f32 %v5083_v36, %v5104_v9  ;;  %v1396_v53 = vand.u32 4294901760, %v1395_v61  ;;  %v5164_v7 = vand.u32 4294901760, %v5139_v45  ;;  %v1424_v61 = vand.u32 4294901760, %v1423_v30  ;;  %v1254_v30 = vld [vmem:[#allocation10 + $0x80] sm:$0xff] }
 0x114   : > { %3641 = vmatprep.subr.mxu0 %v5061_v20  ;;  %3628 = vmatpush3.msra.mxu1 %v4801_v5  ;;  %v5119_v5 = vand.u32 4294901760, %v1263_v55  ;;  %v5136_v41 = vand.u32 4294901760, %v5111_v57  ;;  %v5240_v2 = vsub.f32 %v1256_v34, %v5207_v60 }
 0x115   : > { %3642 = vmatpush3.msra.mxu0 %v5061_v20  ;;  %3629 = vmatprep.subr.mxu1 %v4823_v23  ;;  %v1403_v42 = vand.u32 4294901760, %v1402_v17  ;;  %v1430_v26 = vsub.f32 %v5139_v45, %v5164_v7  ;;  %v5201_v17 = vand.u32 4294901760, %v5179_v14 }
 0x116   : > { %3643 = vmatprep.subr.mxu0 %v5067_v21  ;;  %3600 = vmatprep.mubr.f32.mxu0 %v4924_v24  ;;  %v5153_v47 = vsub.f32 %v1263_v55, %v5119_v5  ;;  %v5195_v55 = vand.u32 4294901760, %v1257_v13 }
 0x117   : > { %3630 = vmatpush3.msra.mxu1 %v4823_v23  ;;  %3644 = vmatpush3.msra.mxu0 %v5067_v21  ;;  %v5133_v23 = vand.u32 4294901760, %v1262_v62  ;;  %6295 = vst [vmem:[#allocation27_spill] sm:$0xff] %v5201_v17 }
 0x118   : > { %3601 = vmatmul.mubr.f32.gmra.mxu0 %v4931_v25  ;;  %3631 = vmatprep.subr.mxu1 %v4839_v46  ;;  %v5176_v39 = vand.u32 4294901760, %v5153_v47  ;;  %v5228_v3 = vsub.f32 %v1257_v13, %v5195_v55 }
 0x119   : > { %3645 = vmatprep.subr.mxu0 %v5078_v33  ;;  %3632 = vmatpush3.msra.mxu1 %v4839_v46  ;;  %v1409_v46 = vsub.f32 %v5099_v54, %v5122_v6  ;;  %v5167_v40 = vsub.f32 %v1262_v62, %v5133_v23 }
 0x11a   : > { %3646 = vmatpush3.msra.mxu0 %v5078_v33  ;;  %3633 = vmatprep.subr.mxu1 %v4852_v51  ;;  %6293 = vst [vmem:[#allocation28_spill] sm:$0xff] %v5176_v39  ;;  %v1437_v62 = vsub.f32 %v5153_v47, %v5176_v39  ;;  %v5216_v39 = vsub.f32 %v1258_v12, %v5182_v15  ;;  %v5231_v12 = vand.u32 4294901760, %v1254_v30 }
 0x11b   : > { %3647 = vmatprep.subr.mxu0 %v5087_v37  ;;  %3634 = vmatpush3.msra.mxu1 %v4852_v51  ;;  %v1416_v51 = vsub.f32 %v5111_v57, %v5136_v41  ;;  %v1410_v48 = vand.u32 4294901760, %v1409_v46  ;;  %v5188_v31 = vand.u32 4294901760, %v5167_v40  ;;  %v1431_v46 = vand.u32 4294901760, %v1430_v26 }
 0x11c   : > { %3635 = vmatprep.mubr.f32.mxu1 %v6292_v38  ;;  %3648 = vmatpush3.msra.mxu0 %v5087_v37  ;;  %v1451_v26 = vsub.f32 %v5179_v14, %v5201_v17  ;;  %v5237_v17 = vand.u32 4294901760, %v5216_v39 }
 0x11d   : > { %3636 = vmatmul.mubr.f32.vlgmr.msra.gmra.mxu1 %v4811_v11  ;;  %3649 = vmatprep.subr.mxu0 %v5096_v49  ;;  %v1417_v19 = vand.u32 4294901760, %v1416_v51  ;;  %6294 = vst [vmem:[#allocation29_spill] sm:$0xff] %v5188_v31  ;;  %v5213_v51 = vand.u32 4294901760, %v5191_v44 }
 0x11e   : > { %3679 = vmatprep.subr.mxu1 %v1396_v53  ;;  %3650 = vmatpush3.msra.mxu0 %v5096_v49  ;;  %6298 = vst [vmem:[#allocation34_spill] sm:$0xff] %v5237_v17  ;;  %v1452_v13 = vand.u32 4294901760, %v1451_v26  ;;  %v5257_v26 = vand.u32 4294901760, %v5240_v2 }
 0x11f   : > { %3680 = vmatpush3.msra.mxu1 %v1396_v53  ;;  %3651 = vmatprep.subr.mxu0 %v5108_v56  ;;  %v5204_v53 = vsub.f32 %v1259_v35, %v5170_v18  ;;  %6296 = vst [vmem:[#allocation32_spill] sm:$0xff] %v5213_v51  ;;  %v5219_v35 = vand.u32 4294901760, %v1255_v22 }
 0x120   : > { %3681 = vmatprep.subr.mxu1 %v1403_v42  ;;  %3638 = vmatprep.mubr.f32.mxu1 %v4924_v24  ;;  %6299 = vst [vmem:[#allocation35_spill] sm:$0xff] %v5257_v26 }
 0x121   : > { %3652 = vmatpush3.msra.mxu0 %v5108_v56  ;;  %3682 = vmatpush3.msra.mxu1 %v1403_v42  ;;  %v1444_v42 = vsub.f32 %v5167_v40, %v5188_v31  ;;  %v5225_v31 = vand.u32 4294901760, %v5204_v53 }
 0x122   : > { %3639 = vmatmul.mubr.f32.gmra.mxu1 %v4931_v25  ;;  %3653 = vmatprep.subr.mxu0 %v5119_v5 }
 0x123   : > { %3683 = vmatprep.subr.mxu1 %v1410_v48  ;;  %3654 = vmatpush3.msra.mxu0 %v5119_v5  ;;  %6297 = vst [vmem:[#allocation33_spill] sm:$0xff] %v5225_v31 }
 0x124   : > { %3684 = vmatpush3.msra.mxu1 %v1410_v48  ;;  %3655 = vmatprep.subr.mxu0 %v5133_v23  ;;  %v1438_v48 = vand.u32 4294901760, %v1437_v62  ;;  %v1458_v62 = vsub.f32 %v5191_v44, %v5213_v51  ;;  %v5250_v51 = vsub.f32 %v1255_v22, %v5219_v35 }
 0x125   : > { %3685 = vmatprep.subr.mxu1 %v1417_v19  ;;  %3656 = vmatpush3.msra.mxu0 %v5133_v23 }
 0x126   : > { %3686 = vmatpush3.msra.mxu1 %v1417_v19  ;;  %3657 = vmatprep.subr.mxu0 %v5147_v4  ;;  %v1445_v19 = vand.u32 4294901760, %v1444_v42  ;;  %v5247_v42 = vand.u32 4294901760, %v5228_v3  ;;  %v1459_v34 = vand.u32 4294901760, %v1458_v62  ;;  %v5267_v62 = vand.u32 4294901760, %v5250_v51 }
 0x127   : > { %3687 = vmatprep.subr.mxu1 %v1424_v61  ;;  %3658 = vmatpush3.msra.mxu0 %v5147_v4 }
 0x128   : > { %3688 = vmatpush3.msra.mxu1 %v1424_v61  ;;  %3659 = vmatprep.subr.mxu0 %v5161_v58  ;;  %v1465_v61 = vsub.f32 %v5204_v53, %v5225_v31  ;;  %v5260_v31 = vsub.f32 %v1254_v30, %v5231_v12 }
 0x129   : > { %3689 = vmatprep.subr.mxu1 %v1431_v46  ;;  %3660 = vmatpush3.msra.mxu0 %v5161_v58 }
 0x12a   : > { %3690 = vmatpush3.msra.mxu1 %v1431_v46  ;;  %3661 = vmatprep.subr.mxu0 %v5170_v18  ;;  %v1472_v46 = vsub.f32 %v5216_v39, %v5237_v17  ;;  %v1466_v22 = vand.u32 4294901760, %v1465_v61  ;;  %v5274_v17 = vand.u32 4294901760, %v5260_v31 }
 0x12b   : > { %3691 = vmatprep.subr.mxu1 %v1438_v48  ;;  %3662 = vmatpush3.msra.mxu0 %v5170_v18 }
 0x12c   : > { %3692 = vmatpush3.msra.mxu1 %v1438_v48  ;;  %3663 = vmatprep.subr.mxu0 %v5182_v15  ;;  %v1479_v48 = vsub.f32 %v5228_v3, %v5247_v42  ;;  %v1473_v30 = vand.u32 4294901760, %v1472_v46 }
 0x12d   : > { %3693 = vmatprep.subr.mxu1 %v1445_v19  ;;  %3664 = vmatpush3.msra.mxu0 %v5182_v15 }
 0x12e   : > { %3694 = vmatpush3.msra.mxu1 %v1445_v19  ;;  %3665 = vmatprep.subr.mxu0 %v5195_v55  ;;  %v1486_v19 = vsub.f32 %v5240_v2, %v5257_v26  ;;  %v1480_v61 = vand.u32 4294901760, %v1479_v48  ;;  %v1500_v26 = vsub.f32 %v5260_v31, %v5274_v17 }
 0x12f   : > { %3695 = vmatprep.subr.mxu1 %v1452_v13  ;;  %3666 = vmatpush3.msra.mxu0 %v5195_v55 }
 0x130   : > { %3696 = vmatpush3.msra.mxu1 %v1452_v13  ;;  %3667 = vmatprep.subr.mxu0 %v5207_v60  ;;  %v1493_v13 = vsub.f32 %v5250_v51, %v5267_v62  ;;  %v1487_v46 = vand.u32 4294901760, %v1486_v19 }
 0x131   : > { %3697 = vmatprep.subr.mxu1 %v1459_v34  ;;  %3668 = vmatpush3.msra.mxu0 %v5207_v60 }
 0x132   : > { %3698 = vmatpush3.msra.mxu1 %v1459_v34  ;;  %3669 = vmatprep.subr.mxu0 %v5219_v35  ;;  %v1494_v34 = vand.u32 4294901760, %v1493_v13 }
 0x133   : > { %3699 = vmatprep.subr.mxu1 %v1466_v22  ;;  %3670 = vmatpush3.msra.mxu0 %v5219_v35 }
 0x134   : > { %3700 = vmatpush3.msra.mxu1 %v1466_v22  ;;  %3671 = vmatprep.subr.mxu0 %v5231_v12  ;;  %v1501_v22 = vand.u32 4294901760, %v1500_v26 }
 0x135   : > { %3701 = vmatprep.subr.mxu1 %v1473_v30  ;;  %3672 = vmatpush3.msra.mxu0 %v5231_v12 }
 0x136   : > { %3702 = vmatpush3.msra.mxu1 %v1473_v30  ;;  %3673 = vmatprep.mubr.f32.mxu0 %v4902_v1 }
 0x137   : > { %3703 = vmatprep.subr.mxu1 %v1480_v61  ;;  %3717 = vmatprep.subr.mxu0 %v5074_v32 }
 0x138   : > { %3674 = vmatmul.mubr.f32.vlgmr.msra.gmra.mxu0 %v4905_v50  ;;  %3704 = vmatpush3.msra.mxu1 %v1480_v61  ;;  %v2051_v61 = vld [vmem:[#allocation10 + $0x130] sm:$0xff] }
 0x139   : > { %3718 = vmatpush3.msra.mxu0 %v5074_v32  ;;  %3705 = vmatprep.subr.mxu1 %v1487_v46  ;;  %v6302_v32 = vld [vmem:[#allocation30_spill] sm:$0xff] }
 0x13a   : > { %3719 = vmatprep.subr.mxu0 %v5083_v36  ;;  %3706 = vmatpush3.msra.mxu1 %v1487_v46 }
 0x13b   : > { %3720 = vmatpush3.msra.mxu0 %v5083_v36  ;;  %3707 = vmatprep.subr.mxu1 %v1494_v34  ;;  %v5387_v36 = vld [vmem:[#allocation2 + $0x3] sm:$0x1] }
 0x13c   : > { %3721 = vmatprep.subr.mxu0 %v5099_v54  ;;  %3708 = vmatpush3.msra.mxu1 %v1494_v34  ;;  %6303 = vst [vmem:[#allocation38_spill] sm:$0xff] %v5387_v36 }
 0x13d   : > { %3722 = vmatpush3.msra.mxu0 %v5099_v54  ;;  %3709 = vmatprep.subr.mxu1 %v1501_v22  ;;  %v5396_v54 = vld [vmem:[#allocation2 + $0x1] sm:$0x1] }
 0x13e   : > { %3723 = vmatprep.subr.mxu0 %v5111_v57  ;;  %3710 = vmatpush3.msra.mxu1 %v1501_v22 }
 0x13f   : > { %3711 = vmatprep.mubr.f32.mxu1 %v6292_v38  ;;  %3724 = vmatpush3.msra.mxu0 %v5111_v57  ;;  %v6311_v57 = vld [vmem:[#allocation34_spill] sm:$0xff] }
 0x140   : > { %3712 = vmatmul.mubr.f32.vlgmr.msra.gmra.mxu1 %v4811_v11  ;;  %3725 = vmatprep.subr.mxu0 %v5125_v10 }
 0x141   : > { %3755 = vmatprep.subr.mxu1 %v5061_v20  ;;  %3726 = vmatpush3.msra.mxu0 %v5125_v10 }
 0x142   : > { %3756 = vmatpush3.msra.mxu1 %v5061_v20  ;;  %3727 = vmatprep.subr.mxu0 %v5139_v45 }
 0x143   : > { %3757 = vmatprep.subr.mxu1 %v5067_v21  ;;  %3728 = vmatpush3.msra.mxu0 %v5139_v45 }
 0x144   : > { %3758 = vmatpush3.msra.mxu1 %v5067_v21  ;;  %3729 = vmatprep.subr.mxu0 %v5153_v47 }
 0x145   : > { %3759 = vmatprep.subr.mxu1 %v5078_v33  ;;  %3730 = vmatpush3.msra.mxu0 %v5153_v47 }
 0x146   : > { %3760 = vmatpush3.msra.mxu1 %v5078_v33  ;;  %3731 = vmatprep.subr.mxu0 %v5167_v40 }
 0x147   : > { %3761 = vmatprep.subr.mxu1 %v5087_v37  ;;  %3732 = vmatpush3.msra.mxu0 %v5167_v40  ;;  %v2055_v40 = vld [vmem:[#allocation10 + $0x150] sm:$0xff] }
 0x148   : > { %3762 = vmatpush3.msra.mxu1 %v5087_v37  ;;  %3733 = vmatprep.subr.mxu0 %v5179_v14 }
 0x149   : > { %3763 = vmatprep.subr.mxu1 %v5096_v49  ;;  %3734 = vmatpush3.msra.mxu0 %v5179_v14 }
 0x14a   : > { %3764 = vmatpush3.msra.mxu1 %v5096_v49  ;;  %3735 = vmatprep.subr.mxu0 %v5191_v44 }
 0x14b   : > { %3765 = vmatprep.subr.mxu1 %v5108_v56  ;;  %3736 = vmatpush3.msra.mxu0 %v5191_v44  ;;  %v2053_v44 = vld [vmem:[#allocation10 + $0x140] sm:$0xff] }
 0x14c   : > { %3766 = vmatpush3.msra.mxu1 %v5108_v56  ;;  %3737 = vmatprep.subr.mxu0 %v5204_v53  ;;  %v5499_v48 = vand.u32 4294901760, %v2053_v44 }
 0x14d   : > { %3767 = vmatprep.subr.mxu1 %v5119_v5  ;;  %3738 = vmatpush3.msra.mxu0 %v5204_v53 }
 0x14e   : > { %3768 = vmatpush3.msra.mxu1 %v5119_v5  ;;  %3739 = vmatprep.subr.mxu0 %v5216_v39 }
 0x14f   : > { %3769 = vmatprep.subr.mxu1 %v5133_v23  ;;  %3740 = vmatpush3.msra.mxu0 %v5216_v39  ;;  %v2054_v39 = vld [vmem:[#allocation10 + $0x148] sm:$0xff] }
 0x150   : > { %3770 = vmatpush3.msra.mxu1 %v5133_v23  ;;  %3741 = vmatprep.subr.mxu0 %v5228_v3  ;;  %v5485_v53 = vand.u32 4294901760, %v2054_v39 }
 0x151   : > { %3771 = vmatprep.subr.mxu1 %v5147_v4  ;;  %3742 = vmatpush3.msra.mxu0 %v5228_v3  ;;  %v5378_v3 = vld [vmem:[#allocation2] sm:$0x1] }
 0x152   : > { %3772 = vmatpush3.msra.mxu1 %v5147_v4  ;;  %3743 = vmatprep.subr.mxu0 %v5240_v2  ;;  %6301 = vst [vmem:[#allocation37_spill] sm:$0xff] %v5378_v3  ;;  %v5512_v13 = vsub.f32 %v2054_v39, %v5485_v53 }
 0x153   : > { %3773 = vmatprep.subr.mxu1 %v5161_v58  ;;  %3676 = vmatprep.mubr.f32.mxu0 %v4979_v43 }
 0x154   : > { %3744 = vmatpush3.msra.mxu0 %v5240_v2  ;;  %3774 = vmatpush3.msra.mxu1 %v5161_v58  ;;  %v5369_v2 = vld [vmem:[#allocation2 + $0x2] sm:$0x1] }
 0x155   : > { %3677 = vmatmul.mubr.f32.gmra.mxu0 %v4985_v52  ;;  %3745 = vmatprep.subr.mxu0 %v5250_v51  ;;  %6300 = vst [vmem:[#allocation36_spill] sm:$0xff] %v5369_v2 }
 0x156   : > { %3775 = vmatprep.subr.mxu1 %v5170_v18  ;;  %3746 = vmatpush3.msra.mxu0 %v5250_v51 }
 0x157   : > { %3776 = vmatpush3.msra.mxu1 %v5170_v18  ;;  %3747 = vmatprep.subr.mxu0 %v5260_v31 }
 0x158   : > { %3777 = vmatprep.subr.mxu1 %v5182_v15  ;;  %3748 = vmatpush3.msra.mxu0 %v5260_v31  ;;  %v5476_v31 = vand.u32 4294901760, %v2055_v40 }
 0x159   : > { %3749 = vmatprep.mubr.f32.mxu0 %v4827_v28  ;;  %3778 = vmatpush3.msra.mxu1 %v5182_v15 }
 0x15a   : > { %3714 = vmatprep.mubr.f32.mxu1 %v4924_v24  ;;  %3750 = vmatmul.mubr.f32.vlgmr.msra.gmra.mxu0 %v4843_v0  ;;  %v5507_v30 = vsub.f32 %v2055_v40, %v5476_v31 }
 0x15b   : > { %3779 = vmatprep.subr.mxu1 %v5195_v55  ;;  %3793 = vmatprep.subr.mxu0 %v5092_v8 }
 0x15c   : > { %3715 = vmatmul.mubr.f32.gmra.mxu1 %v4931_v25  ;;  %3794 = vmatpush3.msra.mxu0 %v5092_v8  ;;  %v6305_v8 = vld [vmem:[#allocation28_spill] sm:$0xff] }
 0x15d   : > { %3780 = vmatpush3.msra.mxu1 %v5195_v55  ;;  %3795 = vmatprep.subr.mxu0 %v5104_v9  ;;  %6306 = vst [vmem:[#allocation28_spill] sm:$0xff] %v5396_v54 }
 0x15e   : > { %3781 = vmatprep.subr.mxu1 %v5207_v60  ;;  %3752 = vmatprep.mubr.f32.mxu0 %v4939_v27 }
 0x15f   : > { %3782 = vmatpush3.msra.mxu1 %v5207_v60  ;;  %3796 = vmatpush3.msra.mxu0 %v5104_v9  ;;  %v6308_v9 = vld [vmem:[#allocation27_spill] sm:$0xff] }
 0x160   : > { %3753 = vmatmul.mubr.f32.gmra.mxu0 %v4947_v29  ;;  %3783 = vmatprep.subr.mxu1 %v5219_v35 }
 0x161   : > { %3797 = vmatprep.subr.mxu0 %v5122_v6  ;;  %3784 = vmatpush3.msra.mxu1 %v5219_v35 }
 0x162   : > { %3798 = vmatpush3.msra.mxu0 %v5122_v6  ;;  %3785 = vmatprep.subr.mxu1 %v5231_v12 }
 0x163   : > { %3799 = vmatprep.subr.mxu0 %v5136_v41  ;;  %3786 = vmatpush3.msra.mxu1 %v5231_v12 }
 0x164   : > { %3787 = vmatprep.mubr.f32.mxu1 %v4861_v59  ;;  %3800 = vmatpush3.msra.mxu0 %v5136_v41  ;;  %v2058_v41 = vld [vmem:[#allocation10 + $0x168] sm:$0xff] }
 0x165   : > { %3788 = vmatmul.mubr.f32.vlgmr.msra.gmra.mxu1 %v4868_v63  ;;  %3801 = vmatprep.subr.mxu0 %v5150_v16 }
 0x166   : > { %3831 = vmatprep.subr.mxu1 %v5061_v20  ;;  %3802 = vmatpush3.msra.mxu0 %v5150_v16  ;;  %v2056_v16 = vld [vmem:[#allocation10 + $0x158] sm:$0xff] }
 0x167   : > { %3832 = vmatpush3.msra.mxu1 %v5061_v20  ;;  %329 = vrot.lane.b32.xlu1 %v5369_v2, %s4439_s18  ;;  %v6304_v20 = vld [vmem:[#allocation31_spill] sm:$0xff] }
 0x168   : > { %3803 = vmatprep.subr.mxu0 %v5164_v7  ;;  %3833 = vmatprep.subr.mxu1 %v5067_v21 }
 0x169   : > { %3790 = vmatprep.mubr.f32.mxu1 %v6302_v32  ;;  %3804 = vmatpush3.msra.mxu0 %v5164_v7 }
 0x16a   : > { %3834 = vmatpush3.msra.mxu1 %v5067_v21  ;;  %325 = vrot.lane.b32.xlu0 %v5378_v3, %s4439_s18  ;;  %v6307_v21 = vld [vmem:[#allocation29_spill] sm:$0xff] }
 0x16b   : > { %3791 = vmatmul.mubr.f32.gmra.mxu1 %v6304_v20  ;;  %3805 = vmatprep.subr.mxu0 %v6305_v8 }
 0x16c   : > { %3835 = vmatprep.subr.mxu1 %v5078_v33  ;;  %3806 = vmatpush3.msra.mxu0 %v6305_v8  ;;  %v2050_v8 = vld [vmem:[#allocation10 + $0x128] sm:$0xff] }
 0x16d   : > { %3836 = vmatpush3.msra.mxu1 %v5078_v33  ;;  %331 = vrot.lane.b32.xlu1 %v5387_v36, %s4439_s18  ;;  %v6309_v33 = vld [vmem:[#allocation32_spill] sm:$0xff] }
 0x16e   : > { %3807 = vmatprep.subr.mxu0 %v6307_v21  ;;  %3837 = vmatprep.subr.mxu1 %v5087_v37 }
 0x16f   : > { %3808 = vmatpush3.msra.mxu0 %v6307_v21  ;;  %3838 = vmatpush3.msra.mxu1 %v5087_v37  ;;  %v6310_v37 = vld [vmem:[#allocation33_spill] sm:$0xff]  ;;  %v5526_v21 = vsub.f32 %v2053_v44, %v5499_v48 }
 0x170   : > { %327 = vrot.lane.b32.xlu0 %v5396_v54, %s4439_s18  ;;  %3809 = vmatprep.subr.mxu0 %v6308_v9 }
 0x171   : > { %3839 = vmatprep.subr.mxu1 %v5096_v49  ;;  %3810 = vmatpush3.msra.mxu0 %v6308_v9  ;;  %v5532_v9 = vand.u32 4294901760, %v2051_v61 }
 0x172   : > { %3840 = vmatpush3.msra.mxu1 %v5096_v49  ;;  %342 = vrot.lane.b32.xlu1 %v5396_v54, %s4441_s6  ;;  %v2060_v49 = vld [vmem:[#allocation10 + $0x178] sm:$0xff] }
 0x173   : > { %3811 = vmatprep.subr.mxu0 %v6309_v33  ;;  %3841 = vmatprep.subr.mxu1 %v5108_v56  ;;  %v5429_v6 = vand.u32 4294901760, %v2060_v49 }
 0x174   : > { %3812 = vmatpush3.msra.mxu0 %v6309_v33  ;;  %3842 = vmatpush3.msra.mxu1 %v5108_v56  ;;  %v2059_v56 = vld [vmem:[#allocation10 + $0x170] sm:$0xff]  ;;  %v5535_v33 = vand.u32 4294901760, %v5507_v30 }
 0x175   : > { %340 = vrot.lane.b32.xlu0 %v5378_v3, %s4441_s6  ;;  %3813 = vmatprep.subr.mxu0 %v6310_v37  ;;  %v5435_v10 = vand.u32 4294901760, %v2059_v56  ;;  %v5442_v45 = vsub.f32 %v2060_v49, %v5429_v6  ;;  %v2049_v49 = vld [vmem:[#allocation10 + $0x120] sm:$0xff] }
 0x176   : > { %3843 = vmatprep.subr.mxu1 %v5119_v5  ;;  %3814 = vmatpush3.msra.mxu0 %v6310_v37  ;;  %v5539_v37 = vand.u32 4294901760, %v5512_v13  ;;  %v2221_v39 = vsub.f32 %v5507_v30, %v5535_v33  ;;  %v5556_v44 = vand.u32 4294901760, %v2049_v49 }
 0x177   : > { %3844 = vmatpush3.msra.mxu1 %v5119_v5  ;;  %346 = vrot.lane.b32.xlu1 %v5387_v36, %s4441_s6  ;;  %v6312_v5 = vld [vmem:[#allocation35_spill] sm:$0xff]  ;;  %v5451_v47 = vsub.f32 %v2059_v56, %v5435_v10  ;;  %v5460_v7 = vand.u32 4294901760, %v5442_v45 }
 0x178   : > { %3815 = vmatprep.subr.mxu0 %v6311_v57  ;;  %3845 = vmatprep.subr.mxu1 %v5133_v23  ;;  %6313 = vst [vmem:[#allocation29_spill] sm:$0xff] %v5539_v37  ;;  %v2046_v36 = vld [vmem:[#allocation10 + $0x108] sm:$0xff]  ;;  %v5584_v54 = vsub.f32 %v2049_v49, %v5556_v44 }
 0x179   : > { %3816 = vmatpush3.msra.mxu0 %v6311_v57  ;;  %3846 = vmatpush3.msra.mxu1 %v5133_v23  ;;  %v2057_v23 = vld [vmem:[#allocation10 + $0x160] sm:$0xff] }
 0x17a   : > { %344 = vrot.lane.b32.xlu0 %v5369_v2, %s4441_s6  ;;  %3817 = vmatprep.subr.mxu0 %v5247_v42  ;;  %v2222_v2 = vand.u32 4294901760, %v2221_v39  ;;  %v5590_v39 = vand.u32 4294901760, %v2046_v36 }
 0x17b   : > { %3847 = vmatprep.subr.mxu1 %v5147_v4  ;;  %3818 = vmatpush3.msra.mxu0 %v5247_v42 }
 0x17c   : > { %3848 = vmatpush3.msra.mxu1 %v5147_v4  ;;  %3819 = vmatprep.subr.mxu0 %v6312_v5  ;;  %v5446_v4 = vand.u32 4294901760, %v2058_v41 }
 0x17d   : > { %3849 = vmatprep.subr.mxu1 %v5161_v58  ;;  %3820 = vmatpush3.msra.mxu0 %v6312_v5  ;;  %v5544_v5 = vand.u32 4294901760, %v2050_v8 }
 0x17e   : > { %3850 = vmatpush3.msra.mxu1 %v5161_v58  ;;  %3821 = vmatprep.subr.mxu0 %v5267_v62  ;;  %v5455_v58 = vand.u32 4294901760, %v2057_v23  ;;  %v5467_v14 = vsub.f32 %v2058_v41, %v5446_v4 }
 0x17f   : > { %3851 = vmatprep.subr.mxu1 %v5170_v18  ;;  %3822 = vmatpush3.msra.mxu0 %v5267_v62  ;;  %v2052_v62 = vld [vmem:[#allocation10 + $0x138] sm:$0xff] }
 0x180   : > { %3852 = vmatpush3.msra.mxu1 %v5170_v18  ;;  %3823 = vmatprep.subr.mxu0 %v5274_v17  ;;  %v5464_v18 = vand.u32 4294901760, %v2056_v16  ;;  %v5490_v51 = vand.u32 4294901760, %v5467_v14  ;;  %v5518_v46 = vand.u32 4294901760, %v2052_v62 }
 0x181   : > { %3853 = vmatprep.subr.mxu1 %v5182_v15  ;;  %3824 = vmatpush3.msra.mxu0 %v5274_v17  ;;  %v5479_v17 = vsub.f32 %v2057_v23, %v5455_v58  ;;  %v5551_v23 = vand.u32 4294901760, %v5526_v21 }
 0x182   : > { %3825 = vmatprep.mubr.f32.mxu0 %v6292_v38  ;;  %3854 = vmatpush3.msra.mxu1 %v5182_v15  ;;  %v5472_v15 = vand.u32 4294901760, %v5451_v47  ;;  %v5493_v42 = vsub.f32 %v2056_v16, %v5464_v18  ;;  %v5547_v41 = vsub.f32 %v2052_v62, %v5518_v46  ;;  %v2048_v16 = vld [vmem:[#allocation10 + $0x118] sm:$0xff]  ;;  %v2047_v62 = vld [vmem:[#allocation10 + $0x110] sm:$0xff] }
 0x183   : > { %3826 = vmatmul.mubr.f32.vlgmr.msra.gmra.mxu0 %v4811_v11  ;;  %3855 = vmatprep.subr.mxu1 %v5195_v55  ;;  %6314 = vst [vmem:[#allocation27_spill] sm:$0xff] %v5551_v23 }
 0x184   : > { %3869 = vmatprep.subr.mxu0 %v5429_v6  ;;  %3856 = vmatpush3.msra.mxu1 %v5195_v55  ;;  %v2186_v55 = vsub.f32 %v5442_v45, %v5460_v7  ;;  %v2193_v26 = vsub.f32 %v5451_v47, %v5472_v15  ;;  %v5521_v34 = vand.u32 4294901760, %v5493_v42 }
 0x185   : > { %3870 = vmatpush3.msra.mxu0 %v5429_v6  ;;  %3857 = vmatprep.subr.mxu1 %v5207_v60 }
 0x186   : > { %3871 = vmatprep.subr.mxu0 %v5435_v10  ;;  %3828 = vmatprep.mubr.f32.mxu0 %v4924_v24  ;;  %v2187_v19 = vand.u32 4294901760, %v2186_v55  ;;  %v2194_v22 = vand.u32 4294901760, %v2193_v26  ;;  %v2214_v56 = vsub.f32 %v5493_v42, %v5521_v34  ;;  %v5559_v55 = vsub.f32 %v2051_v61, %v5532_v9 }
 0x187   : > { %3858 = vmatpush3.msra.mxu1 %v5207_v60  ;;  %3872 = vmatpush3.msra.mxu0 %v5435_v10  ;;  %v5504_v60 = vand.u32 4294901760, %v5479_v17  ;;  %v2228_v26 = vsub.f32 %v5512_v13, %v5539_v37  ;;  %v5572_v61 = vsub.f32 %v2050_v8, %v5544_v5 }
 0x188   : > { %3829 = vmatmul.mubr.f32.gmra.mxu0 %v4931_v25  ;;  %3859 = vmatprep.subr.mxu1 %v5219_v35  ;;  %v5581_v3 = vand.u32 4294901760, %v5559_v55 }
 0x189   : > { %3873 = vmatprep.subr.mxu0 %v5446_v4  ;;  %3860 = vmatpush3.msra.mxu1 %v5219_v35  ;;  %v2200_v35 = vsub.f32 %v5467_v14, %v5490_v51  ;;  %v2229_v8 = vand.u32 4294901760, %v2228_v26  ;;  %v5593_v37 = vand.u32 4294901760, %v5572_v61 }
 0x18a   : > { %3874 = vmatpush3.msra.mxu0 %v5446_v4  ;;  %3861 = vmatprep.subr.mxu1 %v5231_v12  ;;  %6316 = vst [vmem:[#allocation33_spill] sm:$0xff] %v5581_v3 }
 0x18b   : > { %3875 = vmatprep.subr.mxu0 %v5455_v58  ;;  %3862 = vmatpush3.msra.mxu1 %v5231_v12  ;;  %v2207_v12 = vsub.f32 %v5479_v17, %v5504_v60  ;;  %v2201_v57 = vand.u32 4294901760, %v2200_v35  ;;  %v5566_v35 = vand.u32 4294901760, %v2048_v16  ;;  %6317 = vst [vmem:[#allocation34_spill] sm:$0xff] %v5593_v37 }
 0x18c   : > { %3863 = vmatprep.mubr.f32.mxu1 %v6292_v38  ;;  %3876 = vmatpush3.msra.mxu0 %v5455_v58 }
 0x18d   : > { %3864 = vmatmul.mubr.f32.vlgmr.msra.gmra.mxu1 %v4811_v11  ;;  %3877 = vmatprep.subr.mxu0 %v5464_v18  ;;  %v2208_v40 = vand.u32 4294901760, %v2207_v12  ;;  %v2235_v12 = vsub.f32 %v5526_v21, %v5551_v23  ;;  %v5596_v20 = vsub.f32 %v2048_v16, %v5566_v35 }
 0x18e   : > { %3907 = vmatprep.subr.mxu1 %v2187_v19  ;;  %3878 = vmatpush3.msra.mxu0 %v5464_v18 }
 0x18f   : > { %3908 = vmatpush3.msra.mxu1 %v2187_v19  ;;  %3879 = vmatprep.subr.mxu0 %v5476_v31  ;;  %v2215_v19 = vand.u32 4294901760, %v2214_v56  ;;  %v5578_v56 = vand.u32 4294901760, %v2047_v62  ;;  %v2236_v49 = vand.u32 4294901760, %v2235_v12  ;;  %v5615_v12 = vand.u32 4294901760, %v5596_v20 }
 0x190   : > { %3909 = vmatprep.subr.mxu1 %v2194_v22  ;;  %3866 = vmatprep.mubr.f32.mxu1 %v4924_v24 }
 0x191   : > { %3880 = vmatpush3.msra.mxu0 %v5476_v31  ;;  %3910 = vmatpush3.msra.mxu1 %v2194_v22  ;;  %v5569_v22 = vand.u32 4294901760, %v5547_v41  ;;  %v5608_v32 = vsub.f32 %v2047_v62, %v5578_v56 }
 0x192   : > { %3867 = vmatmul.mubr.f32.gmra.mxu1 %v4931_v25  ;;  %3881 = vmatprep.subr.mxu0 %v5485_v53 }
 0x193   : > { %3911 = vmatprep.subr.mxu1 %v2201_v57  ;;  %3882 = vmatpush3.msra.mxu0 %v5485_v53  ;;  %6315 = vst [vmem:[#allocation32_spill] sm:$0xff] %v5569_v22  ;;  %v2242_v23 = vsub.f32 %v5547_v41, %v5569_v22  ;;  %v5605_v22 = vand.u32 4294901760, %v5584_v54 }
 0x194   : > { %3912 = vmatpush3.msra.mxu1 %v2201_v57  ;;  %3883 = vmatprep.subr.mxu0 %v5499_v48  ;;  %v2045_v57 = vld [vmem:[#allocation10 + $0x100] sm:$0xff] }
 0x195   : > { %3913 = vmatprep.subr.mxu1 %v2208_v40  ;;  %3884 = vmatpush3.msra.mxu0 %v5499_v48  ;;  %v5602_v26 = vand.u32 4294901760, %v2045_v57  ;;  %6318 = vst [vmem:[#allocation35_spill] sm:$0xff] %v5605_v22  ;;  %v2243_v16 = vand.u32 4294901760, %v2242_v23  ;;  %v2263_v62 = vsub.f32 %v5584_v54, %v5605_v22  ;;  %v5625_v23 = vand.u32 4294901760, %v5608_v32 }
 0x196   : > { %3914 = vmatpush3.msra.mxu1 %v2208_v40  ;;  %3885 = vmatprep.subr.mxu0 %v5518_v46  ;;  %v2249_v40 = vsub.f32 %v5559_v55, %v5581_v3  ;;  %v5618_v3 = vsub.f32 %v2046_v36, %v5590_v39 }
 0x197   : > { %3915 = vmatprep.subr.mxu1 %v2215_v19  ;;  %3886 = vmatpush3.msra.mxu0 %v5518_v46  ;;  %6319 = vst [vmem:[#allocation39_spill] sm:$0xff] %v5625_v23 }
 0x198   : > { %3916 = vmatpush3.msra.mxu1 %v2215_v19  ;;  %3887 = vmatprep.subr.mxu0 %v5532_v9  ;;  %v2256_v19 = vsub.f32 %v5572_v61, %v5593_v37  ;;  %v5628_v37 = vsub.f32 %v2045_v57, %v5602_v26  ;;  %v2264_v57 = vand.u32 4294901760, %v2263_v62 }
 0x199   : > { %3917 = vmatprep.subr.mxu1 %v2222_v2  ;;  %3888 = vmatpush3.msra.mxu0 %v5532_v9 }
 0x19a   : > { %3918 = vmatpush3.msra.mxu1 %v2222_v2  ;;  %3889 = vmatprep.subr.mxu0 %v5544_v5  ;;  %v2250_v2 = vand.u32 4294901760, %v2249_v40  ;;  %v2257_v36 = vand.u32 4294901760, %v2256_v19  ;;  %v5635_v40 = vand.u32 4294901760, %v5618_v3  ;;  %v5642_v22 = vand.u32 4294901760, %v5628_v37 }
 0x19b   : > { %3919 = vmatprep.subr.mxu1 %v2229_v8  ;;  %3890 = vmatpush3.msra.mxu0 %v5544_v5 }
 0x19c   : > { %3920 = vmatpush3.msra.mxu1 %v2229_v8  ;;  %3891 = vmatprep.subr.mxu0 %v5556_v44  ;;  %v2270_v8 = vsub.f32 %v5596_v20, %v5615_v12 }
 0x19d   : > { %3921 = vmatprep.subr.mxu1 %v2236_v49  ;;  %3892 = vmatpush3.msra.mxu0 %v5556_v44 }
 0x19e   : > { %3922 = vmatpush3.msra.mxu1 %v2236_v49  ;;  %3893 = vmatprep.subr.mxu0 %v5566_v35  ;;  %v2277_v49 = vsub.f32 %v5608_v32, %v5625_v23  ;;  %v2271_v19 = vand.u32 4294901760, %v2270_v8  ;;  %v2291_v23 = vsub.f32 %v5628_v37, %v5642_v22 }
 0x19f   : > { %3923 = vmatprep.subr.mxu1 %v2243_v16  ;;  %3894 = vmatpush3.msra.mxu0 %v5566_v35 }
 0x1a0   : > { %3924 = vmatpush3.msra.mxu1 %v2243_v16  ;;  %3895 = vmatprep.subr.mxu0 %v5578_v56  ;;  %v2284_v16 = vsub.f32 %v5618_v3, %v5635_v40  ;;  %v2278_v62 = vand.u32 4294901760, %v2277_v49 }
 0x1a1   : > { %3925 = vmatprep.subr.mxu1 %v2250_v2  ;;  %3896 = vmatpush3.msra.mxu0 %v5578_v56 }
 0x1a2   : > { %3926 = vmatpush3.msra.mxu1 %v2250_v2  ;;  %3897 = vmatprep.subr.mxu0 %v5590_v39  ;;  %v2285_v2 = vand.u32 4294901760, %v2284_v16 }
 0x1a3   : > { %3927 = vmatprep.subr.mxu1 %v2257_v36  ;;  %3898 = vmatpush3.msra.mxu0 %v5590_v39 }
 0x1a4   : > { %3928 = vmatpush3.msra.mxu1 %v2257_v36  ;;  %3899 = vmatprep.subr.mxu0 %v5602_v26  ;;  %v2292_v36 = vand.u32 4294901760, %v2291_v23  ;;  %v318_v23 = vlaneseq }
 0x1a5   : > { %3929 = vmatprep.subr.mxu1 %v2264_v57  ;;  %3900 = vmatpush3.msra.mxu0 %v5602_v26 }
 0x1a6   : > { %3930 = vmatpush3.msra.mxu1 %v2264_v57  ;;  %3901 = vmatprep.mubr.f32.mxu0 %v4902_v1  ;;  %v6325_v1 = vld [vmem:[#allocation33_spill] sm:$0xff] }
 0x1a7   : > { %3931 = vmatprep.subr.mxu1 %v2271_v19  ;;  %3945 = vmatprep.subr.mxu0 %v5442_v45 }
 0x1a8   : > { %3902 = vmatmul.mubr.f32.vlgmr.msra.gmra.mxu0 %v4905_v50  ;;  %3932 = vmatpush3.msra.mxu1 %v2271_v19  ;;  %v6322_v50 = vld [vmem:[#allocation29_spill] sm:$0xff]  ;;  %v5910_v19 = vand.u32 127, %v318_v23 }
 0x1a9   : > { %3946 = vmatpush3.msra.mxu0 %v5442_v45  ;;  %3933 = vmatprep.subr.mxu1 %v2278_v62 }
 0x1aa   : > { %3947 = vmatprep.subr.mxu0 %v5451_v47  ;;  %3934 = vmatpush3.msra.mxu1 %v2278_v62  ;;  %vm324_vm0 = vcmp.eq.s32.totalorder %v5910_v19, 0  ;;  %vm339_vm1 = vcmp.eq.s32.totalorder %v5910_v19, 127 }
 0x1ab   : > { %3948 = vmatpush3.msra.mxu0 %v5451_v47  ;;  %3935 = vmatprep.subr.mxu1 %v2285_v2 }
 0x1ac   : > { %3949 = vmatprep.subr.mxu0 %v5467_v14  ;;  %3936 = vmatpush3.msra.mxu1 %v2285_v2 }
 0x1ad   : > { %3950 = vmatpush3.msra.mxu0 %v5467_v14  ;;  %3937 = vmatprep.subr.mxu1 %v2292_v36 }
 0x1ae   : > { %3951 = vmatprep.subr.mxu0 %v5479_v17  ;;  %3938 = vmatpush3.msra.mxu1 %v2292_v36 }
 0x1af   : > { %3939 = vmatprep.mubr.f32.mxu1 %v6292_v38  ;;  %3952 = vmatpush3.msra.mxu0 %v5479_v17 }
 0x1b0   : > { %3940 = vmatmul.mubr.f32.vlgmr.msra.gmra.mxu1 %v4811_v11  ;;  %3953 = vmatprep.subr.mxu0 %v5493_v42 }
 0x1b1   : > { %3983 = vmatprep.subr.mxu1 %v5429_v6  ;;  %3954 = vmatpush3.msra.mxu0 %v5493_v42 }
 0x1b2   : > { %3984 = vmatpush3.msra.mxu1 %v5429_v6  ;;  %3955 = vmatprep.subr.mxu0 %v5507_v30 }
 0x1b3   : > { %3985 = vmatprep.subr.mxu1 %v5435_v10  ;;  %3956 = vmatpush3.msra.mxu0 %v5507_v30 }
 0x1b4   : > { %3986 = vmatpush3.msra.mxu1 %v5435_v10  ;;  %3957 = vmatprep.subr.mxu0 %v5512_v13 }
 0x1b5   : > { %3987 = vmatprep.subr.mxu1 %v5446_v4  ;;  %3958 = vmatpush3.msra.mxu0 %v5512_v13 }
 0x1b6   : > { %3988 = vmatpush3.msra.mxu1 %v5446_v4  ;;  %3959 = vmatprep.subr.mxu0 %v5526_v21 }
 0x1b7   : > { %3989 = vmatprep.subr.mxu1 %v5455_v58  ;;  %3960 = vmatpush3.msra.mxu0 %v5526_v21 }
 0x1b8   : > { %3990 = vmatpush3.msra.mxu1 %v5455_v58  ;;  %3961 = vmatprep.subr.mxu0 %v5547_v41 }
 0x1b9   : > { %3991 = vmatprep.subr.mxu1 %v5464_v18  ;;  %3962 = vmatpush3.msra.mxu0 %v5547_v41 }
 0x1ba   : > { %3992 = vmatpush3.msra.mxu1 %v5464_v18  ;;  %3963 = vmatprep.subr.mxu0 %v5559_v55 }
 0x1bb   : > { %3993 = vmatprep.subr.mxu1 %v5476_v31  ;;  %3964 = vmatpush3.msra.mxu0 %v5559_v55 }
 0x1bc   : > { %3994 = vmatpush3.msra.mxu1 %v5476_v31  ;;  %3965 = vmatprep.subr.mxu0 %v5572_v61 }
 0x1bd   : > { %3995 = vmatprep.subr.mxu1 %v5485_v53  ;;  %3966 = vmatpush3.msra.mxu0 %v5572_v61 }
 0x1be   : > { %3996 = vmatpush3.msra.mxu1 %v5485_v53  ;;  %3967 = vmatprep.subr.mxu0 %v5584_v54 }
 0x1bf   : > { %3997 = vmatprep.subr.mxu1 %v5499_v48  ;;  %3968 = vmatpush3.msra.mxu0 %v5584_v54 }
 0x1c0   : > { %3998 = vmatpush3.msra.mxu1 %v5499_v48  ;;  %3969 = vmatprep.subr.mxu0 %v5596_v20 }
 0x1c1   : > { %3999 = vmatprep.subr.mxu1 %v5518_v46  ;;  %3970 = vmatpush3.msra.mxu0 %v5596_v20 }
 0x1c2   : > { %4000 = vmatpush3.msra.mxu1 %v5518_v46  ;;  %3971 = vmatprep.subr.mxu0 %v5608_v32 }
 0x1c3   : > { %4001 = vmatprep.subr.mxu1 %v5532_v9  ;;  %3904 = vmatprep.mubr.f32.mxu0 %v4979_v43  ;;  %v6328_v43 = vld [vmem:[#allocation39_spill] sm:$0xff] }
 0x1c4   : > { %3972 = vmatpush3.msra.mxu0 %v5608_v32  ;;  %4002 = vmatpush3.msra.mxu1 %v5532_v9  ;;  %v5804_v32 = vld [vmem:[#allocation3 + $0x3] sm:$0x1] }
 0x1c5   : > { %3905 = vmatmul.mubr.f32.gmra.mxu0 %v4985_v52  ;;  %3973 = vmatprep.subr.mxu0 %v5618_v3  ;;  %v5791_v52 = vld [vmem:[#allocation3 + $0x1] sm:$0x1] }
 0x1c6   : > { %4003 = vmatprep.subr.mxu1 %v5544_v5  ;;  %3974 = vmatpush3.msra.mxu0 %v5618_v3  ;;  %v5797_v3 = vld [vmem:[#allocation3] sm:$0x1] }
 0x1c7   : > { %4004 = vmatpush3.msra.mxu1 %v5544_v5  ;;  %3975 = vmatprep.subr.mxu0 %v5628_v37 }
 0x1c8   : > { %4005 = vmatprep.subr.mxu1 %v5556_v44  ;;  %3976 = vmatpush3.msra.mxu0 %v5628_v37 }
 0x1c9   : > { %3977 = vmatprep.mubr.f32.mxu0 %v4827_v28  ;;  %4006 = vmatpush3.msra.mxu1 %v5556_v44  ;;  %v6320_v28 = vld [vmem:[#allocation30_spill] sm:$0xff] }
 0x1ca   : > { %3942 = vmatprep.mubr.f32.mxu1 %v4924_v24  ;;  %3978 = vmatmul.mubr.f32.vlgmr.msra.gmra.mxu0 %v4843_v0  ;;  %v6321_v0 = vld [vmem:[#allocation31_spill] sm:$0xff] }
 0x1cb   : > { %4007 = vmatprep.subr.mxu1 %v5566_v35  ;;  %4021 = vmatprep.subr.mxu0 %v5460_v7 }
 0x1cc   : > { %3943 = vmatmul.mubr.f32.gmra.mxu1 %v4931_v25  ;;  %4022 = vmatpush3.msra.mxu0 %v5460_v7 }
 0x1cd   : > { %4008 = vmatpush3.msra.mxu1 %v5566_v35  ;;  %4023 = vmatprep.subr.mxu0 %v5472_v15 }
 0x1ce   : > { %4009 = vmatprep.subr.mxu1 %v5578_v56  ;;  %3980 = vmatprep.mubr.f32.mxu0 %v4939_v27  ;;  %v6326_v27 = vld [vmem:[#allocation34_spill] sm:$0xff] }
 0x1cf   : > { %4010 = vmatpush3.msra.mxu1 %v5578_v56  ;;  %4024 = vmatpush3.msra.mxu0 %v5472_v15 }
 0x1d0   : > { %3981 = vmatmul.mubr.f32.gmra.mxu0 %v4947_v29  ;;  %4011 = vmatprep.subr.mxu1 %v5590_v39  ;;  %v6327_v29 = vld [vmem:[#allocation35_spill] sm:$0xff] }
 0x1d1   : > { %4025 = vmatprep.subr.mxu0 %v5490_v51  ;;  %4012 = vmatpush3.msra.mxu1 %v5590_v39 }
 0x1d2   : > { %4026 = vmatpush3.msra.mxu0 %v5490_v51  ;;  %4013 = vmatprep.subr.mxu1 %v5602_v26 }
 0x1d3   : > { %4027 = vmatprep.subr.mxu0 %v5504_v60  ;;  %4014 = vmatpush3.msra.mxu1 %v5602_v26 }
 0x1d4   : > { %4015 = vmatprep.mubr.f32.mxu1 %v4861_v59  ;;  %4028 = vmatpush3.msra.mxu0 %v5504_v60  ;;  %v6323_v59 = vld [vmem:[#allocation27_spill] sm:$0xff] }
 0x1d5   : > { %4016 = vmatmul.mubr.f32.vlgmr.msra.gmra.mxu1 %v4868_v63  ;;  %4029 = vmatprep.subr.mxu0 %v5521_v34  ;;  %v6324_v63 = vld [vmem:[#allocation32_spill] sm:$0xff] }
 0x1d6   : > { %4059 = vmatprep.subr.mxu1 %v5429_v6  ;;  %4030 = vmatpush3.msra.mxu0 %v5521_v34 }
 0x1d7   : > { %4060 = vmatpush3.msra.mxu1 %v5429_v6  ;;  %4031 = vmatprep.subr.mxu0 %v5535_v33  ;;  %v5836_v6 = vpop.f32.mrf.mxu1 }
 0x1d8   : > { %4061 = vmatprep.subr.mxu1 %v5435_v10  ;;  %4018 = vmatprep.mubr.f32.mxu1 %v6320_v28 }
 0x1d9   : > { %4032 = vmatpush3.msra.mxu0 %v5535_v33  ;;  %4062 = vmatpush3.msra.mxu1 %v5435_v10  ;;  %v5840_v10 = vpop.f32.mrf.mxu1  ;;  %v330_v61 = vpop.permute.xlu1 %329 }
 0x1da   : > { %4019 = vmatmul.mubr.f32.gmra.mxu1 %v6321_v0  ;;  %4033 = vmatprep.subr.mxu0 %v6322_v50 }
 0x1db   : > { %4063 = vmatprep.subr.mxu1 %v5446_v4  ;;  %4034 = vmatpush3.msra.mxu0 %v6322_v50  ;;  %v359_v50 = vstv %s4660_s14  ;;  %s2875_s14 = scalar_lea.sflag [#allocation8], %s4618_s2 }
 0x1dc   : > { %4064 = vmatpush3.msra.mxu1 %v5446_v4  ;;  %4035 = vmatprep.subr.mxu0 %v6323_v59  ;;  %v5844_v4 = vpop.f32.mrf.mxu1 }
 0x1dd   : > { %4065 = vmatprep.subr.mxu1 %v5455_v58  ;;  %4036 = vmatpush3.msra.mxu0 %v6323_v59  ;;  %v354_v59 = vstv %s4658_s3  ;;  %s6139_s3 = scalar_lea.hbm %s6202_s5, %s3048_s30 }
 0x1de   : > { %4066 = vmatpush3.msra.mxu1 %v5455_v58  ;;  %4037 = vmatprep.subr.mxu0 %v6324_v63  ;;  %v5848_v58 = vpop.f32.mrf.mxu1 }
 0x1df   : > { %4067 = vmatprep.subr.mxu1 %v5464_v18  ;;  %4038 = vmatpush3.msra.mxu0 %v6324_v63  ;;  %v332_v8 = vpop.permute.xlu1 %331 }
 0x1e0   : > { %4068 = vmatpush3.msra.mxu1 %v5464_v18  ;;  %4039 = vmatprep.subr.mxu0 %v6325_v1  ;;  %v5852_v18 = vpop.f32.mrf.mxu1 }
 0x1e1   : > { %4069 = vmatprep.subr.mxu1 %v5476_v31  ;;  %4040 = vmatpush3.msra.mxu0 %v6325_v1 }
 0x1e2   : > { %4070 = vmatpush3.msra.mxu1 %v5476_v31  ;;  %4041 = vmatprep.subr.mxu0 %v6326_v27  ;;  %v5856_v15 = vpop.f32.mrf.mxu1 }
 0x1e3   : > { %4071 = vmatprep.subr.mxu1 %v5485_v53  ;;  %4042 = vmatpush3.msra.mxu0 %v6326_v27 }
 0x1e4   : > { %4072 = vmatpush3.msra.mxu1 %v5485_v53  ;;  %4043 = vmatprep.subr.mxu0 %v6327_v29  ;;  %v5860_v17 = vpop.f32.mrf.mxu1  ;;  %v343_v2 = vpop.permute.xlu1 %342 }
 0x1e5   : > { %4073 = vmatprep.subr.mxu1 %v5499_v48  ;;  %4044 = vmatpush3.msra.mxu0 %v6327_v29  ;;  %v6343_v29 = vld [vmem:[#allocation28_spill] sm:$0xff] }
 0x1e6   : > { %4074 = vmatpush3.msra.mxu1 %v5499_v48  ;;  %4045 = vmatprep.subr.mxu0 %v5615_v12  ;;  %v5864_v51 = vpop.f32.mrf.mxu1 }
 0x1e7   : > { %4075 = vmatprep.subr.mxu1 %v5518_v46  ;;  %4046 = vmatpush3.msra.mxu0 %v5615_v12 }
 0x1e8   : > { %4076 = vmatpush3.msra.mxu1 %v5518_v46  ;;  %4047 = vmatprep.subr.mxu0 %v6328_v43  ;;  %v5868_v48 = vpop.f32.mrf.mxu1 }
 0x1e9   : > { %4077 = vmatprep.subr.mxu1 %v5532_v9  ;;  %4048 = vmatpush3.msra.mxu0 %v6328_v43  ;;  %v361_v43 = vmul.f32 %v359_v50, %v6343_v29 }
 0x1ea   : > { %4078 = vmatpush3.msra.mxu1 %v5532_v9  ;;  %4049 = vmatprep.subr.mxu0 %v5635_v40  ;;  %v5872_v30 = vpop.f32.mrf.mxu1 }
 0x1eb   : > { %4079 = vmatprep.subr.mxu1 %v5544_v5  ;;  %4050 = vmatpush3.msra.mxu0 %v5635_v40 }
 0x1ec   : > { %4080 = vmatpush3.msra.mxu1 %v5544_v5  ;;  %4051 = vmatprep.subr.mxu0 %v5642_v22  ;;  %v5876_v46 = vpop.f32.mrf.mxu1 }
 0x1ed   : > { %4081 = vmatprep.subr.mxu1 %v5556_v44  ;;  %4052 = vmatpush3.msra.mxu0 %v5642_v22 }
 0x1ee   : > { %4053 = vmatprep.mubr.f32.mxu0 %v6292_v38  ;;  %4082 = vmatpush3.msra.mxu1 %v5556_v44  ;;  %v5880_v21 = vpop.f32.mrf.mxu1 }
 0x1ef   : > { %4054 = vmatmul.mubr.f32.vlgmr.msra.gmra.mxu0 %v4811_v11  ;;  %4083 = vmatprep.subr.mxu1 %v5566_v35 }
 0x1f0   : > { %4084 = vmatpush3.msra.mxu1 %v5566_v35  ;;  %4056 = vmatprep.mubr.f32.mxu0 %v4924_v24 }
 0x1f1   : > { %4085 = vmatprep.subr.mxu1 %v5578_v56  ;;  %4091 = vmatprep.mubr.f32.mxu1 %v6292_v38  ;;  %v5810_v38 = vld [vmem:[#allocation3 + $0x2] sm:$0x1] }
 0x1f2   : > { %4086 = vmatpush3.msra.mxu1 %v5578_v56  ;;  %388 = vrot.lane.b32.xlu1 %v5791_v52, %s4439_s18 }
 0x1f3   : > { %4057 = vmatmul.mubr.f32.gmra.mxu0 %v4931_v25  ;;  %4087 = vmatprep.subr.mxu1 %v5590_v39 }
 0x1f4   : > { %4088 = vmatpush3.msra.mxu1 %v5590_v39  ;;  %386 = vrot.lane.b32.xlu0 %v5797_v3, %s4439_s18  ;;  %v326_v39 = vpop.permute.xlu0 %325 }
 0x1f5   : > { %4089 = vmatprep.subr.mxu1 %v5602_v26 }
 0x1f6   : > { %4090 = vmatpush3.msra.mxu1 %v5602_v26  ;;  %392 = vrot.lane.b32.xlu1 %v5804_v32, %s4439_s18 }
 0x1f7   : > { %4092 = vmatmul.mubr.f32.vlgmr.msra.gmra.mxu1 %v4811_v11  ;;  %v5828_v11 = vpop.f32.mrf.mxu0 }
 0x1f8   : > { %4094 = vmatprep.mubr.f32.mxu1 %v4924_v24  ;;  %390 = vrot.lane.b32.xlu0 %v5810_v38, %s4439_s18  ;;  %v328_v49 = vpop.permute.xlu0 %327  ;;  %s5931_s18 = scalar_select %p312_p5, 1, 0 }
 0x1f9   : > { %v5830_v24 = vpop.f32.mrf.mxu0  ;;  %v336_v63 = vsel %vm324_vm0, 0.0, %v328_v49  ;;  %v351_v49 = vsel %vm339_vm1, 0.0, %v343_v2 }
 0x1fa   : > { %400 = vrot.lane.b32.xlu1 %v5791_v52, %s4441_s6  ;;  %s314_s16 = scvt.s32.f32 %s5931_s18 }
 0x1fb   : > { %4095 = vmatmul.mubr.f32.gmra.mxu1 %v4931_v25  ;;  %v5832_v20 = vpop.f32.mrf.mxu0 }
 0x1fc   : > { %398 = vrot.lane.b32.xlu0 %v5797_v3, %s4441_s6  ;;  %v341_v28 = vpop.permute.xlu0 %340 }
 0x1fd   : > { %v5834_v54 = vpop.f32.mrf.mxu0 }
 0x1fe   : > { %404 = vrot.lane.b32.xlu1 %v5804_v32, %s4441_s6 }
 0x1ff   : > { %v5838_v25 = vpop.f32.mrf.mxu0 }
 0x200   : > { %402 = vrot.lane.b32.xlu0 %v5810_v38, %s4441_s6  ;;  %v5884_v33 = vpop.f32.mrf.mxu1 }
 0x201   : > { %v5842_v45 = vpop.f32.mrf.mxu0 }
 0x202   : > { %v5888_v5 = vpop.f32.mrf.mxu1 }
 0x203   : > { %v5846_v47 = vpop.f32.mrf.mxu0 }
 0x205   : > { %v5850_v7 = vpop.f32.mrf.mxu0 }
 0x207   : > { %v5854_v14 = vpop.f32.mrf.mxu0 }
 0x209   : > { %v5858_v31 = vpop.f32.mrf.mxu0 }
 0x20b   : > { %v5862_v53 = vpop.f32.mrf.mxu0 }
 0x20d   : > { %v5866_v42 = vpop.f32.mrf.mxu0 }
 0x20f   : > { %v5870_v60 = vpop.f32.mrf.mxu0 }
 0x211   : > { %v5874_v13 = vpop.f32.mrf.mxu0 }
 0x215   : > { %v5878_v34 = vpop.f32.mrf.mxu0 }
 0x217   : > { %v5882_v9 = vpop.f32.mrf.mxu0 }
 0x21a   : > { %v5886_v37 = vpop.f32.mrf.mxu0 }
 0x21c   : > { %v5890_v41 = vpop.f32.mrf.mxu1  ;;  %v5892_v44 = vpop.f32.mrf.mxu0 }
 0x21d   : > { %6329 = vst [vmem:[#allocation30_spill] sm:$0xff] %v5892_v44 }
 0x21e   : > { %v5894_v55 = vpop.f32.mrf.mxu1 }
 0x220   : > { %v5896_v35 = vpop.f32.mrf.mxu0 }
 0x221   : > { %6330 = vst [vmem:[#allocation31_spill] sm:$0xff] %v5896_v35  ;;  %v6347_v35 = vld [vmem:[#allocation36_spill] sm:$0xff] }
 0x222   : > { %v5900_v56 = vpop.f32.mrf.mxu0  ;;  %v362_v44 = vmul.f32 %v359_v50, %v6347_v35 }
 0x223   : > { %6332 = vst [vmem:[#allocation27_spill] sm:$0xff] %v5900_v56 }
 0x225   : > { %v5898_v22 = vpop.f32.mrf.mxu1 }
 0x226   : > { %6331 = vst [vmem:[#allocation29_spill] sm:$0xff] %v5898_v22  ;;  %v338_v22 = vsel %vm324_vm0, 0.0, %v332_v8  ;;  %v350_v8 = vsel %vm339_vm1, 0.0, %v341_v28 }
 0x227   : > { %v5902_v26 = vpop.f32.mrf.mxu1 }
 0x228   : > { %6333 = vst [vmem:[#allocation32_spill] sm:$0xff] %v5902_v26 }
 0x22b   : > { %v5906_v40 = vpop.f32.mrf.mxu1 }
 0x22c   : > { %6335 = vst [vmem:[#allocation34_spill] sm:$0xff] %v5906_v40  ;;  %v6346_v40 = vld [vmem:[#allocation37_spill] sm:$0xff] }
 0x22d   : > { %v5912_v16 = vpop.f32.mrf.mxu1  ;;  %v360_v26 = vmul.f32 %v359_v50, %v6346_v40  ;;  %v737_v40 = vadd.f32 %v5848_v58, %v5834_v54  ;;  %v5970_v54 = vshrl.u32 %v318_v23, 7 }
 0x22e   : > { %6337 = vst [vmem:[#allocation39_spill] sm:$0xff] %v5912_v16 }
 0x22f   : > { %vm1226_vm2 = vcmp.eq.s32.totalorder %v5970_v54, 0  ;;  %vm2831_vm3 = vcmp.eq.s32.totalorder %v5970_v54, 7 }
 0x243   : > { %v5904_v12 = vpop.f32.mrf.mxu0 }
 0x244   : > { %6334 = vst [vmem:[#allocation33_spill] sm:$0xff] %v5904_v12  ;;  %v345_v12 = vpop.permute.xlu0 %344 }
 0x245   : > { %v5908_v57 = vpop.f32.mrf.mxu0 }
 0x246   : > { %6336 = vst [vmem:[#allocation35_spill] sm:$0xff] %v5908_v57  ;;  %v368_v57 = vstv %s4665_s28  ;;  %s4320_s28 = scalar_lea.vmem %s6141_s13, 512 }
 0x247   : > { %p4321_p0 = scmp.ne.s32.totalorder %s6141_s13, %s4320_s28 }
 0x248   : > { %v5914_v62 = vpop.f32.mrf.mxu0 }
 0x249   : > { %6338 = vst [vmem:[#allocation40_spill] sm:$0xff] %v5914_v62  ;;  %v347_v62 = vpop.permute.xlu1 %346  ;;  %p4322_p10 = pnand %p4321_p0, %p6368_p4 }
 0x24a   : > { %v5920_v0 = vpop.f32.mrf.mxu0  ;;  %v353_v58 = vsel %vm339_vm1, 0.0, %v347_v62 }
 0x24b   : > { %6340 = vst [vmem:[#allocation42_spill] sm:$0xff] %v5920_v0  ;;  %v335_v0 = vsel %vm324_vm0, 0.0, %v326_v39  ;;  %v372_v62 = vmul.f32 %v368_v57, %v353_v58  ;;  %p4323_p3 = pneg %p4322_p10 }
 0x24c   : > { %v355_v29 = vmul.f32 %v354_v59, %v335_v0  ;;  %v337_v0 = vsel %vm324_vm0, 0.0, %v330_v61 }
 0x24d   : > { %v5917_v36 = vpop.f32.mrf.mxu1  ;;  %v357_v23 = vmul.f32 %v354_v59, %v337_v0 }
 0x24e   : > { %6339 = vst [vmem:[#allocation41_spill] sm:$0xff] %v5917_v36  ;;  %v356_v36 = vmul.f32 %v354_v59, %v336_v63  ;;  %v731_v63 = vadd.f32 %v5836_v6, %v5828_v11  ;;  %v6348_v11 = vld [vmem:[#allocation38_spill] sm:$0xff] }
 0x24f   : > { %v5927_v1 = vpop.f32.mrf.mxu1  ;;  %v363_v6 = vmul.f32 %v359_v50, %v6348_v11  ;;  %v364_v50 = vadd.f32 %v360_v26, %v355_v29 }
 0x250   : > { %6341 = vst [vmem:[#allocation43_spill] sm:$0xff] %v5927_v1  ;;  %v365_v39 = vadd.f32 %v361_v43, %v356_v36  ;;  %v854_v36 = vadd.f32 %v5838_v25, %v731_v63  ;;  %v358_v43 = vmul.f32 %v354_v59, %v338_v22 }
 0x252   : > { %v5939_v16 = vpop.f32.mrf.mxu1  ;;  %v965_v28 = vadd.f32 %v5852_v18, %v854_v36  ;;  %v367_v11 = vadd.f32 %v363_v6, %v358_v43  ;;  %v352_v18 = vsel %vm339_vm1, 0.0, %v345_v12  ;;  %v415_v43 = vstv %s4678_s29 }
 0x253   : > { %6344 = vst [vmem:[#allocation28_spill] sm:$0xff] %v5939_v16  ;;  %v743_v16 = vadd.f32 %v5844_v4, %v5832_v20  ;;  %v725_v20 = vadd.f32 %v5840_v10, %v5830_v24  ;;  %v5968_v4 = vstv %s314_s16  ;;  %v861_v10 = vadd.f32 %v5850_v7, %v737_v40 }
 0x254   : > { %v5964_v35 = vpop.f32.mrf.mxu1 }
 0x255   : > { %6349 = vst [vmem:[#allocation37_spill] sm:$0xff] %v5964_v35  ;;  %v847_v61 = vadd.f32 %v5842_v45, %v725_v20  ;;  %v868_v24 = vadd.f32 %v5846_v47, %v743_v16  ;;  %v1106_v35 = vadd.f32 %v5854_v14, %v965_v28  ;;  %v973_v47 = vadd.f32 %v5864_v51, %v861_v10 }
 0x256   : > { %v376_v51 = vadd.f32 %v372_v62, %v367_v11  ;;  %v418_v10 = vmul.f32 %v415_v43, %v5810_v38 }
 0x257   : > { %v981_v29 = vadd.f32 %v5860_v17, %v868_v24  ;;  %v1211_v16 = vadd.f32 %v5868_v48, %v1106_v35  ;;  %v1112_v6 = vadd.f32 %v5866_v42, %v973_v47  ;;  %v1545_v47 = vadd.f32 %v5884_v33, %v5870_v60 }
 0x258   : > { %v6020_v28 = vmul.f32 %v5968_v4, %v376_v51  ;;  %v6351_v51 = vld [vmem:[#allocation31_spill] sm:$0xff] }
 0x259   : > { %v1118_v40 = vadd.f32 %v5862_v53, %v981_v29  ;;  %v1228_v35 = vrot.slane %v1211_v16, 7  ;;  %v6011_v53 = vadd.f32 %v5880_v21, %v1112_v6  ;;  %v416_v21 = vmul.f32 %v415_v43, %v5797_v3 }
 0x25b   : > { %v6004_v48 = vadd.f32 %v5876_v46, %v1118_v40  ;;  %v1229_v3 = vrot.slane %v6011_v53, 7 }
 0x25d   : > { %v1230_v24 = vrot.slane %v6004_v48, 7 }
 0x264   : > { %v389_v2 = vpop.permute.xlu1 %388 }
 0x265   : > { %v395_v46 = vsel %vm324_vm0, 0.0, %v389_v2 }
 0x268   : > { %v5929_v27 = vpop.f32.mrf.mxu0  ;;  %v393_v26 = vpop.permute.xlu1 %392 }
 0x269   : > { %6342 = vst [vmem:[#allocation44_spill] sm:$0xff] %v5929_v27  ;;  %v370_v27 = vmul.f32 %v368_v57, %v351_v49  ;;  %v369_v49 = vmul.f32 %v368_v57, %v350_v8  ;;  %v371_v8 = vmul.f32 %v368_v57, %v352_v18  ;;  %v424_v18 = vstv %s4680_s8 }
 0x26a   : > { %v5941_v1 = vpop.f32.mrf.mxu0 }
 0x26b   : > { %6345 = vst [vmem:[#allocation45_spill] sm:$0xff] %v5941_v1  ;;  %v5958_v1 = vpop.permute.xlu0 %386  ;;  %v374_v25 = vadd.f32 %v370_v27, %v365_v39  ;;  %v957_v27 = vadd.f32 %v5856_v15, %v847_v61  ;;  %v5988_v39 = vsub.s32 0, %v5970_v54  ;;  %v373_v14 = vadd.f32 %v369_v49, %v364_v50 }
 0x26c   : > { %v366_v15 = vadd.f32 %v362_v44, %v357_v23  ;;  %v401_v42 = vpop.permute.xlu1 %400  ;;  %v417_v50 = vmul.f32 %v415_v43, %v5791_v52  ;;  %v394_v2 = vsel %vm324_vm0, 0.0, %v5958_v1  ;;  %v397_v1 = vsel %vm324_vm0, 0.0, %v393_v26 }
 0x26d   : > { %v379_v7 = vmul.f32 %v5968_v4, %v374_v25  ;;  %v1100_v17 = vadd.f32 %v5858_v31, %v957_v27  ;;  %v378_v31 = vmul.f32 %v5968_v4, %v373_v14  ;;  %v419_v25 = vmul.f32 %v415_v43, %v5804_v32 }
 0x26e   : > { %v375_v20 = vadd.f32 %v371_v8, %v366_v15  ;;  %v407_v27 = vsel %vm339_vm1, 0.0, %v401_v42  ;;  %v1248_v29 = vrot.slane %v6020_v28, %v5988_v39  ;;  %v1551_v26 = vadd.f32 %v5894_v55, %v5882_v9  ;;  %v6350_v55 = vld [vmem:[#allocation30_spill] sm:$0xff]  ;;  %v6352_v42 = vld [vmem:[#allocation27_spill] sm:$0xff] }
 0x26f   : > { %v391_v45 = vpop.permute.xlu0 %390  ;;  %v1205_v0 = vadd.f32 %v5872_v30, %v1100_v17  ;;  %v1240_v44 = vrot.slane %v379_v7, %v5988_v39  ;;  %v410_v30 = vstv %s4676_s11  ;;  %v1236_v52 = vrot.slane %v378_v31, %v5988_v39  ;;  %s4442_s11 = smov [#allocation13]  }
 0x270   : > { %v5975_v63 = vpop.f32.mrf.mxu1  ;;  %v412_v62 = vmul.f32 %v410_v30, %v395_v46  ;;  %v6041_v38 = vmul.f32 %v5968_v4, %v375_v20  ;;  %v1557_v7 = vadd.f32 %v5890_v41, %v5878_v34  ;;  %v411_v14 = vmul.f32 %v410_v30, %v394_v2  ;;  %v405_v16 = vpop.permute.xlu1 %404  ;;  %v6353_v46 = vld [vmem:[#allocation44_spill] sm:$0xff]  ;;  %s4324_s29 = sshll.u32 %s4442_s11, 4  ;;  %s4325_s29 = int_to_ptr.vmem [resolvable:$false] %s4324_s29 }
 0x271   : > { %v1227_v61 = vrot.slane %v1205_v0, 7  ;;  %v6038_v32 = vsel %vm1226_vm2, %v1240_v44, %v1228_v35  ;;  %v1539_v4 = vadd.f32 %v5888_v5, %v5874_v13  ;;  %v396_v15 = vsel %vm324_vm0, 0.0, %v391_v45  ;;  %s4326_s8 = scalar_lea.vmem %s4325_s29, 1024  ;;  %p4327_p7 = scmp.lt.s32.totalorder %s6141_s13, %s4325_s29 }
 0x272   : > { %v5993_v59 = vpop.f32.mrf.mxu1  ;;  %v421_v41 = vadd.f32 %v417_v50, %v412_v62  ;;  %v414_v8 = vmul.f32 %v410_v30, %v397_v1  ;;  %v426_v13 = vmul.f32 %v424_v18, %v407_v27  ;;  %v1244_v9 = vrot.slane %v6041_v38, %v5988_v39  ;;  %p4328_p8 = scmp.lt.s32.totalorder %s4326_s8, %s4320_s28 }
 0x273   : > { %v399_v58 = vpop.permute.xlu0 %398  ;;  %v6065_v60 = vsel %vm1226_vm2, %v1236_v52, %v1227_v61  ;;  %v1668_v5 = vadd.f32 %v5886_v37, %v1545_v47  ;;  %v1661_v45 = vadd.f32 %v6350_v55, %v1539_v4  ;;  %v409_v6 = vsel %vm339_vm1, 0.0, %v405_v16  ;;  %v6354_v61 = vld [vmem:[#allocation29_spill] sm:$0xff]  ;;  %v6357_v4 = vld [vmem:[#allocation34_spill] sm:$0xff] }
 0x274   : > { %v406_v17 = vsel %vm339_vm1, 0.0, %v399_v58  ;;  %v1682_v0 = vadd.f32 %v6351_v51, %v1557_v7  ;;  %v420_v43 = vadd.f32 %v416_v21, %v411_v14  ;;  %v413_v44 = vmul.f32 %v410_v30, %v396_v15  ;;  %v6355_v21 = vld [vmem:[#allocation32_spill] sm:$0xff]  ;;  %v6356_v7 = vld [vmem:[#allocation45_spill] sm:$0xff]  ;;  %p4329_p9 = por %p4328_p8, %p4327_p7 }
 0x275   : > { %v425_v31 = vmul.f32 %v424_v18, %v406_v17  ;;  %v1675_v20 = vadd.f32 %v6352_v42, %v1551_v26  ;;  %v2336_v58 = vadd.f32 %v5975_v63, %v6353_v46  ;;  %v433_v50 = vstv %s317_s17 }
 0x276   : > { %v1779_v2 = vadd.f32 %v6354_v61, %v1668_v5  ;;  %v423_v62 = vadd.f32 %v419_v25, %v414_v8  ;;  %v430_v1 = vadd.f32 %v426_v13, %v421_v41  ;;  %v428_v47 = vmul.f32 %v424_v18, %v409_v6  ;;  %v6359_v5 = vld [vmem:[#allocation33_spill] sm:$0xff]  ;;  %v6364_v61 = vld [vmem:[#allocation43_spill] sm:$0xff]  ;;  %p4330_p12 = pnand %p4329_p9, %p4323_p3 }
 0x277   : > { %v403_v40 = vpop.permute.xlu0 %402  ;;  %v1771_v30 = vadd.f32 %v6355_v21, %v1661_v45  ;;  %v2330_v14 = vadd.f32 %v5993_v59, %v6356_v7  ;;  %v1795_v19 = vadd.f32 %v6357_v4, %v1682_v0  ;;  %v422_v26 = vadd.f32 %v418_v10, %v413_v44  ;;  %v6361_v0 = vld [vmem:[#allocation40_spill] sm:$0xff]  ;;  %v6362_v44 = vld [vmem:[#allocation41_spill] sm:$0xff] }
 0x278   : > { %v408_v37 = vsel %vm339_vm1, 0.0, %v403_v40  ;;  %v429_v15 = vadd.f32 %v425_v31, %v420_v43  ;;  %v6358_v40 = vld [vmem:[#allocation39_spill] sm:$0xff]  ;;  %v1920_v55 = vadd.f32 %v6359_v5, %v1779_v2  ;;  %v435_v45 = vmul.f32 %v433_v50, %v430_v1  ;;  %v6367_v5 = vld [vmem:[#allocation26_spill] sm:$0xff] }
 0x279   : > { %v427_v17 = vmul.f32 %v424_v18, %v408_v37  ;;  %v1787_v25 = vadd.f32 %v6358_v40, %v1675_v20  ;;  %v1932_v43 = vadd.f32 %v6361_v0, %v1795_v19 }
 0x27a   : > { %v434_v31 = vmul.f32 %v433_v50, %v429_v15 }
 0x285   : > { %v5949_v56 = vpop.f32.mrf.mxu0 }
 0x287   : > { %v5977_v22 = vpop.f32.mrf.mxu0 }
 0x28a   : > { %v5995_v12 = vpop.f32.mrf.mxu0 }
 0x28b   : > { %v2459_v16 = vadd.f32 %v5995_v12, %v2336_v58  ;;  %v432_v12 = vadd.f32 %v428_v47, %v423_v62  ;;  %v6363_v58 = vld [vmem:[#allocation42_spill] sm:$0xff]  ;;  %v2845_v62 = vrot.slane %v435_v45, %v5988_v39 }
 0x28c   : > { %v6000_v36 = vpop.f32.mrf.mxu1  ;;  %v6013_v57 = vpop.f32.mrf.mxu0  ;;  %v1926_v37 = vadd.f32 %v6363_v58, %v1787_v25 }
 0x28d   : > { %v2348_v63 = vadd.f32 %v6000_v36, %v5949_v56  ;;  %v2452_v41 = vadd.f32 %v6013_v57, %v2330_v14  ;;  %v6360_v56 = vld [vmem:[#allocation35_spill] sm:$0xff]  ;;  %v2025_v57 = vadd.f32 %v6362_v44, %v1920_v55 }
 0x28e   : > { %v2341_v49 = vpop.f32.mrf.mxu1  ;;  %v1914_v36 = vadd.f32 %v6360_v56, %v1771_v30 }
 0x28f   : > { %v2342_v8 = vadd.f32 %v2341_v49, %v5977_v22  ;;  %v431_v22 = vadd.f32 %v427_v17, %v422_v26  ;;  %v2041_v7 = vadd.f32 %v2025_v57, %v6038_v32  ;;  %v1252_v32 = vsel %vm1226_vm2, %v1248_v29, %v1230_v24  ;;  %v6366_v17 = vld [vmem:[#allocation37_spill] sm:$0xff] }
 0x290   : > { %v3982_v23 = vpop.f32.mrf.mxu0  ;;  %v2019_v2 = vadd.f32 %v6364_v61, %v1914_v36  ;;  %v1251_v24 = vsel %vm1226_vm2, %v1244_v9, %v1229_v3 }
 0x291   : > { %v2473_v10 = vadd.f32 %v3982_v23, %v2348_v63  ;;  %v437_v23 = vmul.f32 %v433_v50, %v432_v12  ;;  %v436_v14 = vmul.f32 %v433_v50, %v431_v22  ;;  %v2031_v50 = vadd.f32 %v6366_v17, %v1926_v37 }
 0x292   : > { %v2465_v34 = vpop.f32.mrf.mxu0  ;;  %v2040_v15 = vadd.f32 %v2019_v2, %v6065_v60 }
 0x293   : > { %v2849_v29 = vrot.slane %v436_v14, %v5988_v39  ;;  %v2042_v12 = vadd.f32 %v2031_v50, %v1251_v24 }
 0x295   : > { %v4017_v11 = vpop.f32.mrf.mxu1 }
 0x296   : > { %v2570_v13 = vadd.f32 %v4017_v11, %v2459_v16  ;;  %v2466_v11 = vadd.f32 %v2465_v34, %v2342_v8  ;;  %v6365_v34 = vld [vmem:[#allocation28_spill] sm:$0xff] }
 0x297   : > { %v2561_v33 = vpop.f32.mrf.mxu1 }
 0x298   : > { %v2562_v51 = vadd.f32 %v2561_v33, %v2452_v41  ;;  %v2853_v41 = vrot.slane %v437_v23, %v5988_v39 }
 0x29a   : > { %v4020_v52 = vpop.f32.mrf.mxu1 }
 0x29b   : > { %v2586_v42 = vadd.f32 %v4020_v52, %v2473_v10  ;;  %v2037_v52 = vadd.f32 %v6365_v34, %v1932_v43 }
 0x29c   : > { %v2577_v59 = vpop.f32.mrf.mxu1 }
 0x29d   : > { %v2578_v1 = vadd.f32 %v2577_v59, %v2466_v11 }
 0x2af   : > { %v4055_v35 = vpop.f32.mrf.mxu0 }
 0x2b0   : > { %v2711_v18 = vadd.f32 %v4055_v35, %v2570_v13  ;;  %v2043_v13 = vadd.f32 %v2037_v52, %v1252_v32 }
 0x2b1   : > { %v2704_v27 = vpop.f32.mrf.mxu0 }
 0x2b2   : > { %v2705_v20 = vadd.f32 %v2704_v27, %v2562_v51  ;;  %v2841_v27 = vrot.slane %v434_v31, %v5988_v39 }
 0x2b3   : > { %v4058_v6 = vpop.f32.mrf.mxu0 }
 0x2b4   : > { %v2723_v47 = vadd.f32 %v4058_v6, %v2586_v42 }
 0x2b5   : > { %v2716_v33 = vpop.f32.mrf.mxu0 }
 0x2b6   : > { %v2717_v63 = vadd.f32 %v2716_v33, %v2578_v1 }
 0x2b7   : > { %v4093_v49 = vpop.f32.mrf.mxu1 }
 0x2b8   : > { %v2816_v46 = vadd.f32 %v4093_v49, %v2711_v18 }
 0x2b9   : > { %v2809_v35 = vpop.f32.mrf.mxu1 }
 0x2ba   : > { %v2833_v21 = vrot.slane %v2816_v46, 1  ;;  %v2810_v30 = vadd.f32 %v2809_v35, %v2705_v20 }
 0x2bb   : > { %v4096_v16 = vpop.f32.mrf.mxu1 }
 0x2bc   : > { %v2855_v4 = vsel %vm2831_vm3, %v2845_v62, %v2833_v21  ;;  %v2832_v19 = vrot.slane %v2810_v30, 1  ;;  %v2828_v26 = vadd.f32 %v4096_v16, %v2723_v47 }
 0x2bd   : > { %v2859_v40 = vadd.f32 %v2855_v4, %v2041_v7  ;;  %v2821_v25 = vpop.f32.mrf.mxu1 }
 0x2be   : > { %v2854_v8 = vsel %vm2831_vm3, %v2841_v27, %v2832_v19  ;;  %v2835_v60 = vrot.slane %v2828_v26, 1  ;;  %v2822_v48 = vadd.f32 %v2821_v25, %v2717_v63 }
 0x2bf   : > { %v2863_v28 = vadd.f32 %v2859_v40, %v6367_v5  ;;  %v2858_v55 = vadd.f32 %v2854_v8, %v2040_v15 }
 0x2c0   : > { %v2857_v59 = vsel %vm2831_vm3, %v2853_v41, %v2835_v60  ;;  %v2834_v45 = vrot.slane %v2822_v48, 1 }
 0x2c1   : > { %v2867_v6 = vmax.f32 %v2863_v28, 0.0  ;;  %v2862_v53 = vadd.f32 %v2858_v55, %v6367_v5  ;;  %v2861_v56 = vadd.f32 %v2857_v59, %v2043_v13 }
 0x2c2   : > { %v2856_v38 = vsel %vm2831_vm3, %v2849_v29, %v2834_v45 }
 0x2c3   : > { %2871 = vst [vmem:[%s4690_s12 + $0x8] sm:$0xff] %v2867_v6  ;;  %v2866_v3 = vmax.f32 %v2862_v53, 0.0  ;;  %v2865_v39 = vadd.f32 %v2861_v56, %v6367_v5  ;;  %v2860_v9 = vadd.f32 %v2856_v38, %v2042_v12 }
 0x2c5   : > { %2870 = vst [vmem:[%s4690_s12] sm:$0xff] %v2866_v3  ;;  %v2869_v36 = vmax.f32 %v2865_v39, 0.0  ;;  %v2864_v10 = vadd.f32 %v2860_v9, %v6367_v5 }
 0x2c7   : > { %2873 = vst [vmem:[%s4690_s12 + $0x18] sm:$0xff] %v2869_v36  ;;  %v2868_v54 = vmax.f32 %v2864_v10, 0.0 }
 0x2c9   : > { %2872 = vst [vmem:[%s4690_s12 + $0x10] sm:$0xff] %v2868_v54 }
 0x2ca   : > { %4333 = shalt.err (!%p4330_p12)
}
 0x2cb   : > { %s4334_s10 = scalar_lea.hbm %s6139_s3, 512  ;;  %s4338_s6 = scalar_lea.hbm %s6202_s5, 2048 }
 0x2cc   : > { %p4335_p1 = scmp.ne.s32.totalorder %s6139_s3, %s4334_s10  ;;  %p4339_p11 = scmp.lt.s32.totalorder %s6139_s3, %s6202_s5 }
 0x2cd   : > { %p4340_p5 = scmp.lt.s32.totalorder %s4338_s6, %s4334_s10 }
 0x2ce   : > { %p4336_p2 = pnand %p4335_p1, %p6368_p4 }
 0x2cf   : > { %p4341_p13 = por %p4340_p5, %p4339_p11 }
 0x2d0   : > { %p4337_p6 = pneg %p4336_p2 }
 0x2d2   : > { %p4342_p0 = pnand %p4341_p13, %p4337_p6 }
 0x2d4   : > { %4345 = shalt.err (!%p4342_p0)
}
 0x2d5   : > { %s4443_s27 = smov 128   ;;  %s4444_s17 = smov 8  }
 0x2d6   : > { %4107 = dma.vmem_to_hbm [thread:$0]  (%p6368_p4), %s6141_s13, 512, %s6139_s3, %s2875_s14, %s4443_s27, %s4437_s9, %s4444_s17  }
 0x2d7 PF: > { %s6369_s19 = sld [smem:[#allocation22_spill]]  ;;  %p4129_p10 = scmp.ge.s32.totalorder %s4428_s1, 2 }
 0x2d8   : > { %s6370_s24 = sld [smem:[#allocation23_spill]] }
 0x2dd   : > { %s2904_s30 = sand.u32 1, %s6369_s19  }
 0x2de   : > { %p6371_p3 = scmp.ne.s32.totalorder %s6370_s24, 0  ;;  %s2905_s23 = scalar_lea.sflag [#allocation8], %s2904_s30 }
 0x2e0   : > { %p4121_p7 = pnand %p4129_p10, %p6371_p3 }
 0x2e2   : > { %p4122_p8 = pneg %p4121_p7 }
 0x2e4   : > { %4395 = dma.done.wait (%p4122_p8), %s2905_s23, 512  }
 0x2e5   : > { %4397 = vsyncadd (%p4122_p8), %s2905_s23, 4294966784  ;;  %s24_s1 = sadd.s32 1, %s4428_s1   ;;  %s6372_s7 = sld [smem:[#allocation24_spill]] }
 0x2e6   : > { %p21_p9 = scmp.ge.s32.totalorder %s24_s1, 6   ;;  %s6373_s2 = sld [smem:[#allocation25_spill]] }
 0x2e7   : > { %s6374_s20 = smov %s4404_s21  ;;  %s6375_s21 = smov %s4408_s22 }
 0x2e8   : > { %s6376_s22 = smov %s4605_s15  ;;  %s6377_s23 = smov %s4420_s25 }
 0x2e9   : > { %s6378_s24 = smov %s4424_s26  ;;  %23 = sbr.rel (!%p21_p9) target bundleno = 14 (0xe), region = 97 }
 0x2eb   : > { %s6379_s25 = smov %s6372_s7 }
 0x2ec   : > { %s6380_s26 = smov %s6373_s2 }
 0x2ee   :  { %2910 = vsyncpa [#allocation7], 1 }
 0x2ef   :  { %2912 = vsyncpa [#allocation7 + $0x1], 1 }
 0x2f0   :  { %2913 = vsyncpa [#allocation12], 1 }
 0x2f1   :  { %2915 = vsyncpa [#allocation12 + $0x1], 1 }
 0x2f2   :  { %2916 = vsyncpa [#allocation8], 1 }
 0x2f3   :  { %2918 = vsyncpa [#allocation8 + $0x1], 1 }
 0x2f4   :  { %2919 = vsyncpa [#allocation9], 1 }
 0x2f5   :  { %2921 = vsyncpa [#allocation9 + $0x1], 1 }
 0x2f6   :  { %2922 = vsyncmov [#allocation4] }
 0x2f9   :  { %s2923_s15 = vpop.sfrf %2922 }
 0x2fa   :  { %p3051_p4 = scmp.ne.s32.totalorder %s2923_s15, 0 }
 0x2fc   :  { %2927 = shalt.err (%p3051_p4)  }
 0x2fd   :  { %2929 = vsyncmov [#allocation4 + $0x1] }
 0x300   :  { %s2930_s9 = vpop.sfrf %2929 }
 0x301   :  { %p3052_p12 = scmp.ne.s32.totalorder %s2930_s9, 0 }
 0x303   :  { %2934 = shalt.err (%p3052_p12)  }

</bundles_post_ra>
